<compile_context>
chip_gen: v7x
topology: tpu7x:2x2x1
jax: 0.10.0
libtpu: 0.0.40
codegen_flags: <defaults>
</compile_context>

<pallas_src>
import functools

import jax
import jax.numpy as jnp
from jax.experimental import pallas as pl
from jax.experimental.pallas import tpu as pltpu

_LANE = 128
_SUBLANE = 8
_NEG_BIG = -1e30  # finite "minus infinity" for masked entries (fits bf16/f32)


def _ce_online_kernel(x_ref, partial_ref, m_sc, l_sc, d_sc, *,
                      n, c, tn, tc, upcast, ragged_rows, ragged_cols):
    i = pl.program_id(0)          # row-tile index ("parallel")
    j = pl.program_id(1)          # class-tile index ("arbitrary", reduction)
    row0 = i * tn                 # global row offset of this tile
    col0 = j * tc                 # global col offset of this tile

    @pl.when(j == 0)
    def _init():
        m_sc[...] = jnp.full_like(m_sc, -jnp.inf)
        l_sc[...] = jnp.zeros_like(l_sc)
        d_sc[...] = jnp.zeros_like(d_sc)

    x = x_ref[...]                                     # (tn, tc)
    if upcast:                                         # no native bf16 VPU
        x = x.astype(jnp.float32)
    if ragged_cols:                                    # mask class padding
        cc = col0 + jax.lax.broadcasted_iota(jnp.int32, (tn, tc), 1)
        x = jnp.where(cc < c, x, jnp.asarray(_NEG_BIG, dtype=x.dtype))

    # Online (running) logsumexp; exp and accumulation in f32.
    m_prev = m_sc[...]                                               # (tn,1)
    m_cur = jnp.max(x, axis=-1, keepdims=True).astype(jnp.float32)
    m_new = jnp.maximum(m_prev, m_cur)
    e = jnp.exp(x.astype(jnp.float32) - m_new)                       # (tn,tc)
    l_sc[...] = l_sc[...] * jnp.exp(m_prev - m_new) + jnp.sum(
        e, axis=-1, keepdims=True)
    m_sc[...] = m_new

    # Diagonal (target) logits: only class tiles whose global column range
    # overlaps this tile's global row range can contain them.
    @pl.when(jnp.logical_and(row0 < col0 + tc, col0 < row0 + tn))
    def _diag():
        rr = row0 + jax.lax.broadcasted_iota(jnp.int32, (tn, tc), 0)
        cc = col0 + jax.lax.broadcasted_iota(jnp.int32, (tn, tc), 1)
        dmask = rr == cc
        if ragged_rows:
            dmask = jnp.logical_and(dmask, rr < n)
        d_sc[...] += jnp.sum(
            jnp.where(dmask, x.astype(jnp.float32), 0.0)).reshape(1, 1)

    @pl.when(j == pl.num_programs(1) - 1)
    def _finalize():
        lse = m_sc[...] + jnp.log(l_sc[...])                         # (tn,1)
        if ragged_rows:
            rr = row0 + jax.lax.broadcasted_iota(jnp.int32, (tn, 1), 0)
            lse = jnp.where(rr < n, lse, 0.0)
        partial_ref[...] = (jnp.sum(lse) - jnp.sum(d_sc[...])).reshape(1, 1, 1)


def _vmem_limit_bytes():
    # Generation-aware scoped-VMEM limit with ~25% headroom.
    cap = 64 * 1024 * 1024  # conservative fallback ~ v7x per-core VMEM
    try:
        info = pltpu.get_tpu_info()
        cap = int(getattr(info, "vmem_capacity_bytes", cap)) or cap
    except Exception:
        pass
    return (cap * 3) // 4


def _native_bf16_vpu():
    # v6e / v7x have a native bf16 VPU/EUP datapath; v5e and older do not.
    try:
        kind = jax.devices()[0].device_kind.lower()
    except Exception:
        return False
    return ("v6" in kind) or ("v7" in kind)


def _pick_tiles(n, c, eff_itemsize, budget):
    row_cands = [t for t in (1024, 512, 256, 128, 64, 32, 16, 8) if t <= n] or [n]
    # Keep the whole class dim resident when a decent row tile fits the budget.
    for tn in row_cands:
        if tn * c * eff_itemsize <= budget:
            return tn, c
    # Vocab-scale C: tile the class dim too (online logsumexp) with the
    # largest lane-aligned column tile that fits next to a medium row tile.
    tn = 256 if n >= 256 else row_cands[0]
    tc = max(_LANE, (budget // (tn * eff_itemsize)) // _LANE * _LANE)
    if tc >= c:
        tc = c
    return tn, tc


def minimal_cross_entropy_loss(logits, tile_rows=None, tile_cols=None):
    """Pallas TPU implementation of MinimalCrossEntropyLoss.forward(logits)."""
    n, c = logits.shape
    if n > c:
        raise ValueError("labels = arange(N) requires N <= num_classes")
    itemsize = jnp.dtype(logits.dtype).itemsize

    vmem_limit = _vmem_limit_bytes()
    # Per-buffer-set budget: double-buffered input + f32 compute temporaries
    # must stay well inside the scoped-VMEM limit on every generation.
    budget = vmem_limit // 4
    eff_itemsize = max(itemsize, 4)  # account for f32 compute temporaries

    tn, tc = _pick_tiles(n, c, eff_itemsize, budget)
    if tile_rows is not None:
        tn = min(int(tile_rows), n)
        if tn != n and tn % _SUBLANE != 0:
            tn = n
    if tile_cols is not None:
        tc = min(int(tile_cols), c)
        if tc != c and tc % _LANE != 0:
            tc = c

    grid_rows = pl.cdiv(n, tn)
    grid_cols = pl.cdiv(c, tc)
    ragged_rows = (n % tn) != 0
    ragged_cols = (c % tc) != 0
    upcast = (jnp.dtype(logits.dtype) != jnp.dtype(jnp.float32)
              and not _native_bf16_vpu())

    kernel = functools.partial(
        _ce_online_kernel, n=n, c=c, tn=tn, tc=tc, upcast=upcast,
        ragged_rows=ragged_rows, ragged_cols=ragged_cols)

    cost = pl.CostEstimate(
        flops=6 * n * c,
        transcendentals=n * c + 2 * n * grid_cols,
        bytes_accessed=n * c * itemsize + grid_rows * 4,
    )

    partials = pl.pallas_call(
        kernel,
        out_shape=jax.ShapeDtypeStruct((grid_rows, 1, 1), jnp.float32),
        grid_spec=pltpu.PrefetchScalarGridSpec(
            num_scalar_prefetch=0,
            grid=(grid_rows, grid_cols),
            in_specs=[pl.BlockSpec((tn, tc), lambda i, j: (i, j))],
            out_specs=pl.BlockSpec((1, 1, 1), lambda i, j: (i, 0, 0)),
            scratch_shapes=[
                pltpu.VMEM((tn, 1), jnp.float32),   # running max
                pltpu.VMEM((tn, 1), jnp.float32),   # running sum of exp
                pltpu.VMEM((1, 1), jnp.float32),    # sum of diagonal logits
            ]),
        compiler_params=pltpu.CompilerParams(
            dimension_semantics=("parallel", "arbitrary"),
            vmem_limit_bytes=vmem_limit),
        cost_estimate=cost,
    )(logits)

    # Mean reduction over the FULL batch size, applied exactly once.
    return jnp.sum(partials) / n


def _reference_loss(logits):
    # Plain-JAX reference (not part of the hot path).
    x = logits.astype(jnp.float32)
    n = x.shape[0]
    lse = jax.scipy.special.logsumexp(x, axis=-1)
    diag = x[jnp.arange(n), jnp.arange(n)]
    return jnp.mean(lse - diag)


if __name__ == "__main__":
    key = jax.random.PRNGKey(0)
    k1, k2, k3, k4 = jax.random.split(key, 4)

    # 1) Multi-row-tile, whole class dim resident (grid=(2, 1)).
    logits_a = jax.random.normal(k1, (256, 512), dtype=jnp.float32)
    ref_a = _reference_loss(logits_a)
    loss_a = jax.block_until_ready(
        minimal_cross_entropy_loss(logits_a, tile_rows=128))
    assert jnp.allclose(loss_a, ref_a, atol=1e-5, rtol=1e-5), (loss_a, ref_a)

    # 2) Same input, automatic tile selection (single block, grid=(1, 1)).
    loss_a2 = jax.block_until_ready(minimal_cross_entropy_loss(logits_a))
    assert jnp.allclose(loss_a2, ref_a, atol=1e-5, rtol=1e-5), (loss_a2, ref_a)

    # 3) Class-tiled online-logsumexp path (grid=(2, 4)).
    loss_a3 = jax.block_until_ready(
        minimal_cross_entropy_loss(logits_a, tile_rows=128, tile_cols=128))
    assert jnp.allclose(loss_a3, ref_a, atol=1e-5, rtol=1e-5), (loss_a3, ref_a)

    # 4) Small shape, single tile (N not a multiple of 128).
    logits_b = jax.random.normal(k2, (8, 128), dtype=jnp.float32)
    ref_b = _reference_loss(logits_b)
    loss_b = jax.block_until_ready(minimal_cross_entropy_loss(logits_b))
    assert jnp.allclose(loss_b, ref_b, atol=1e-5, rtol=1e-5), (loss_b, ref_b)

    # 5) Ragged N and ragged C with masked edge tiles (grid=(2, 3)).
    logits_c = jax.random.normal(k3, (200, 320), dtype=jnp.float32)
    ref_c = _reference_loss(logits_c)
    loss_c = jax.block_until_ready(
        minimal_cross_entropy_loss(logits_c, tile_rows=128, tile_cols=128))
    assert jnp.allclose(loss_c, ref_c, atol=1e-5, rtol=1e-5), (loss_c, ref_c)

    # 6) bf16 input: exp chain and accumulation run in f32.
    logits_d = jax.random.normal(k4, (128, 256), dtype=jnp.bfloat16)
    ref_d = _reference_loss(logits_d)
    loss_d = jax.block_until_ready(minimal_cross_entropy_loss(logits_d))
    assert jnp.allclose(loss_d, ref_d, atol=2e-3, rtol=2e-3), (loss_d, ref_d)

    print("KERNEL_OK")
</pallas_src>

<mosaic_0001>
module attributes {stable_mosaic.version = 11 : i64} {
  func.func @_ce_online_kernel(%arg0: i32, %arg1: i32, %arg2: memref<128x512xf32, #tpu.memory_space<vmem>>, %arg3: memref<1x1x1xf32, #tpu.memory_space<vmem>>, %arg4: memref<128x1xf32, #tpu.memory_space<vmem>>, %arg5: memref<128x1xf32, #tpu.memory_space<vmem>>, %arg6: memref<1x1xf32, #tpu.memory_space<vmem>>) attributes {dimension_semantics = [#tpu.dimension_semantics<parallel>, #tpu.dimension_semantics<arbitrary>], iteration_bounds = array<i64: 2, 1>, scalar_prefetch = 0 : i64, scratch_operands = 3 : i64, tpu.core_type = #tpu.core_type<tc>, window_params = [{transform_indices = @transform_0, window_bounds = array<i64: 128, 512>}, {transform_indices = @transform_1, window_bounds = array<i64: 1, 1, 1>}]} {
    %c128_i32 = arith.constant 128 : i32
    %0 = arith.muli %arg0, %c128_i32 : i32
    %c512_i32 = arith.constant 512 : i32
    %1 = arith.muli %arg1, %c512_i32 : i32
    %c0_i32 = arith.constant 0 : i32
    %2 = arith.cmpi eq, %arg1, %c0_i32 : i32
    %3 = arith.extui %2 : i1 to i32
    %c0_i32_0 = arith.constant 0 : i32
    %4 = arith.cmpi ne, %3, %c0_i32_0 : i32
    scf.if %4 {
      %cst_16 = arith.constant 0xFF800000 : f32
      %32 = vector.broadcast %cst_16 : f32 to vector<128x1xf32>
      %c0_17 = arith.constant 0 : index
      %c0_18 = arith.constant 0 : index
      %33 = vector.load %arg4[%c0_17, %c0_18] : memref<128x1xf32, #tpu.memory_space<vmem>>, vector<128x1xf32>
      tpu.vector_store %arg4[%c0_17, %c0_18], %32 {strides = array<i32>} : memref<128x1xf32, #tpu.memory_space<vmem>>, vector<128x1xf32>,
      %cst_19 = arith.constant 0.000000e+00 : f32
      %34 = vector.broadcast %cst_19 : f32 to vector<128x1xf32>
      %c0_20 = arith.constant 0 : index
      %c0_21 = arith.constant 0 : index
      %35 = vector.load %arg5[%c0_20, %c0_21] : memref<128x1xf32, #tpu.memory_space<vmem>>, vector<128x1xf32>
      tpu.vector_store %arg5[%c0_20, %c0_21], %34 {strides = array<i32>} : memref<128x1xf32, #tpu.memory_space<vmem>>, vector<128x1xf32>,
      %cst_22 = arith.constant 0.000000e+00 : f32
      %36 = vector.broadcast %cst_22 : f32 to vector<1x1xf32>
      %c0_23 = arith.constant 0 : index
      %c0_24 = arith.constant 0 : index
      %37 = vector.load %arg6[%c0_23, %c0_24] : memref<1x1xf32, #tpu.memory_space<vmem>>, vector<1x1xf32>
      tpu.vector_store %arg6[%c0_23, %c0_24], %36 {strides = array<i32>} : memref<1x1xf32, #tpu.memory_space<vmem>>, vector<1x1xf32>,
    } else {
    }
    %c0 = arith.constant 0 : index
    %c0_1 = arith.constant 0 : index
    %5 = vector.load %arg2[%c0, %c0_1] : memref<128x512xf32, #tpu.memory_space<vmem>>, vector<128x512xf32>
    %c0_2 = arith.constant 0 : index
    %c0_3 = arith.constant 0 : index
    %6 = vector.load %arg4[%c0_2, %c0_3] : memref<128x1xf32, #tpu.memory_space<vmem>>, vector<128x1xf32>
    %cst = arith.constant dense<0xFF800000> : vector<128xf32>
    %7 = vector.multi_reduction <maximumf>, %5, %cst [1] : vector<128x512xf32> to vector<128xf32>
    %8 = vector.shape_cast %7 : vector<128xf32> to vector<128x1xf32>
    %9 = arith.maximumf %6, %8 : vector<128x1xf32>
    %10 = vector.broadcast %9 : vector<128x1xf32> to vector<128x512xf32>
    %11 = arith.subf %5, %10 : vector<128x512xf32>
    %12 = math.exp %11 : vector<128x512xf32>
    %c0_4 = arith.constant 0 : index
    %c0_5 = arith.constant 0 : index
    %13 = vector.load %arg5[%c0_4, %c0_5] : memref<128x1xf32, #tpu.memory_space<vmem>>, vector<128x1xf32>
    %14 = arith.subf %6, %9 : vector<128x1xf32>
    %15 = math.exp %14 : vector<128x1xf32>
    %16 = arith.mulf %13, %15 : vector<128x1xf32>
    %cst_6 = arith.constant dense<0.000000e+00> : vector<128xf32>
    %17 = vector.multi_reduction <add>, %12, %cst_6 [1] : vector<128x512xf32> to vector<128xf32>
    %18 = vector.shape_cast %17 : vector<128xf32> to vector<128x1xf32>
    %19 = arith.addf %16, %18 : vector<128x1xf32>
    %c0_7 = arith.constant 0 : index
    %c0_8 = arith.constant 0 : index
    %20 = vector.load %arg5[%c0_7, %c0_8] : memref<128x1xf32, #tpu.memory_space<vmem>>, vector<128x1xf32>
    tpu.vector_store %arg5[%c0_7, %c0_8], %19 {strides = array<i32>} : memref<128x1xf32, #tpu.memory_space<vmem>>, vector<128x1xf32>,
    %c0_9 = arith.constant 0 : index
    %c0_10 = arith.constant 0 : index
    %21 = vector.load %arg4[%c0_9, %c0_10] : memref<128x1xf32, #tpu.memory_space<vmem>>, vector<128x1xf32>
    tpu.vector_store %arg4[%c0_9, %c0_10], %9 {strides = array<i32>} : memref<128x1xf32, #tpu.memory_space<vmem>>, vector<128x1xf32>,
    %c512_i32_11 = arith.constant 512 : i32
    %22 = arith.addi %1, %c512_i32_11 : i32
    %23 = arith.cmpi slt, %0, %22 : i32
    %c128_i32_12 = arith.constant 128 : i32
    %24 = arith.addi %0, %c128_i32_12 : i32
    %25 = arith.cmpi slt, %1, %24 : i32
    %26 = arith.andi %23, %25 : i1
    %27 = arith.extui %26 : i1 to i32
    %c0_i32_13 = arith.constant 0 : i32
    %28 = arith.cmpi ne, %27, %c0_i32_13 : i32
    scf.if %28 {
      %32 = tpu.iota {dimensions = array<i32: 0>} : vector<128x512xi32>
      %33 = vector.broadcast %0 : i32 to vector<128x512xi32>
      %34 = arith.addi %33, %32 : vector<128x512xi32>
      %35 = tpu.iota {dimensions = array<i32: 1>} : vector<128x512xi32>
      %36 = vector.broadcast %1 : i32 to vector<128x512xi32>
      %37 = arith.addi %36, %35 : vector<128x512xi32>
      %38 = arith.cmpi eq, %34, %37 : vector<128x512xi32>
      %c0_16 = arith.constant 0 : index
      %c0_17 = arith.constant 0 : index
      %39 = vector.load %arg6[%c0_16, %c0_17] : memref<1x1xf32, #tpu.memory_space<vmem>>, vector<1x1xf32>
      %cst_18 = arith.constant 0.000000e+00 : f32
      %40 = vector.broadcast %cst_18 : f32 to vector<128x512xf32>
      %41 = arith.select %38, %5, %40 : vector<128x512xi1>, vector<128x512xf32>
      %42 = vector.shape_cast %41 : vector<128x512xf32> to vector<1x128x512xf32>
      %cst_19 = arith.constant dense<0.000000e+00> : vector<1xf32>
      %43 = vector.multi_reduction <add>, %42, %cst_19 [1, 2] : vector<1x128x512xf32> to vector<1xf32>
      %44 = vector.shape_cast %43 : vector<1xf32> to vector<1x1x1xf32>
      %45 = vector.extract %44[0, 0, 0] : f32 from vector<1x1x1xf32>
      %46 = vector.broadcast %45 : f32 to vector<1x1xf32>
      %47 = arith.addf %39, %46 : vector<1x1xf32>
      %c0_20 = arith.constant 0 : index
      %c0_21 = arith.constant 0 : index
      %48 = vector.load %arg6[%c0_20, %c0_21] : memref<1x1xf32, #tpu.memory_space<vmem>>, vector<1x1xf32>
      tpu.vector_store %arg6[%c0_20, %c0_21], %47 {strides = array<i32>} : memref<1x1xf32, #tpu.memory_space<vmem>>, vector<1x1xf32>,
    } else {
    }
    %c0_i32_14 = arith.constant 0 : i32
    %29 = arith.cmpi eq, %arg1, %c0_i32_14 : i32
    %30 = arith.extui %29 : i1 to i32
    %c0_i32_15 = arith.constant 0 : i32
    %31 = arith.cmpi ne, %30, %c0_i32_15 : i32
    scf.if %31 {
      %c0_16 = arith.constant 0 : index
      %c0_17 = arith.constant 0 : index
      %32 = vector.load %arg4[%c0_16, %c0_17] : memref<128x1xf32, #tpu.memory_space<vmem>>, vector<128x1xf32>
      %c0_18 = arith.constant 0 : index
      %c0_19 = arith.constant 0 : index
      %33 = vector.load %arg5[%c0_18, %c0_19] : memref<128x1xf32, #tpu.memory_space<vmem>>, vector<128x1xf32>
      %34 = math.log %33 : vector<128x1xf32>
      %35 = arith.addf %32, %34 : vector<128x1xf32>
      %36 = vector.shape_cast %35 : vector<128x1xf32> to vector<1x128x1xf32>
      %cst_20 = arith.constant dense<0.000000e+00> : vector<1xf32>
      %37 = vector.multi_reduction <add>, %36, %cst_20 [1, 2] : vector<1x128x1xf32> to vector<1xf32>
      %38 = vector.shape_cast %37 : vector<1xf32> to vector<1x1x1xf32>
      %39 = vector.extract %38[0, 0, 0] : f32 from vector<1x1x1xf32>
      %c0_21 = arith.constant 0 : index
      %c0_22 = arith.constant 0 : index
      %40 = vector.load %arg6[%c0_21, %c0_22] : memref<1x1xf32, #tpu.memory_space<vmem>>, vector<1x1xf32>
      %41 = vector.shape_cast %40 : vector<1x1xf32> to vector<1x1x1xf32>
      %cst_23 = arith.constant dense<0.000000e+00> : vector<1xf32>
      %42 = vector.multi_reduction <add>, %41, %cst_23 [1, 2] : vector<1x1x1xf32> to vector<1xf32>
      %43 = vector.shape_cast %42 : vector<1xf32> to vector<1x1x1xf32>
      %44 = vector.extract %43[0, 0, 0] : f32 from vector<1x1x1xf32>
      %45 = arith.subf %39, %44 : f32
      %46 = vector.broadcast %45 : f32 to vector<1x1x1xf32>
      %c0_24 = arith.constant 0 : index
      %c0_25 = arith.constant 0 : index
      %c0_26 = arith.constant 0 : index
      %47 = vector.load %arg3[%c0_24, %c0_25, %c0_26] : memref<1x1x1xf32, #tpu.memory_space<vmem>>, vector<1x1x1xf32>
      tpu.vector_store %arg3[%c0_24, %c0_25, %c0_26], %46 {strides = array<i32>} : memref<1x1x1xf32, #tpu.memory_space<vmem>>, vector<1x1x1xf32>,
    } else {
    }
    return
  }
  func.func @transform_0(%arg0: i32, %arg1: i32) -> (i32, i32) {
    %c0_i32 = arith.constant 0 : i32
    return %arg0, %arg1 : i32, i32
  }
  func.func @transform_1(%arg0: i32, %arg1: i32) -> (i32, i32, i32) {
    %c0_i32 = arith.constant 0 : i32
    %c0_i32_0 = arith.constant 0 : i32
    %c0_i32_1 = arith.constant 0 : i32
    return %arg0, %c0_i32, %c0_i32_0 : i32, i32, i32
  }
}

</mosaic_0001>

<bundles_post_ra>
// kernel: tpu_custom_call.1
= control target key start
LH: loop header
LB: loop body
LE: loop exit
PB: predicated region body
PF: predicated region fallthrough
CT: control target
= control target key end

     0   :  { %6 = vsyncpa [#allocation6], 0  ;;  %s2825_s0 = inlined_call_operand.hbm [shape: f32[256,512], index: 0, kind: input, shape index: {}]   ;;  %s2826_s1 = inlined_call_operand.vmem [shape: f32[2,1,1], index: 1, kind: output, shape index: {}]  }
   0x1   :  { %8 = vsyncpa [#allocation6 + $0x1], 0  ;;  %s1681_s6 = smov 0   ;;  %s1683_s7 = smov 0  }
   0x2   :  { %s1685_s8 = smov 0   ;;  %s1687_s9 = smov 0  }
   0x3   :  { %s1689_s10 = smov 0   ;;  %s1691_s11 = smov 0  }
   0x4 LB: > { %s1307_s12 = sadd.s32 4294967295, %s1663_s11   ;;  %s26_s13 = sadd.s32 1, %s1659_s10  ;;  %s1663_s11 = sphi %s1691_s11, %s14_s11   ;;  %s1659_s10 = sphi %s1689_s10, %s3123_s10   ;;  %s1655_s9 = sphi %s1687_s9, %s3122_s9   ;;  %s1651_s8 = sphi %s1685_s8, %s3121_s8   ;;  %s1647_s7 = sphi %s1683_s7, %s3120_s7   ;;  %s1643_s6 = sphi %s1681_s6, %s3119_s6  }
   0x5   : > { %p28_p0 = scmp.ge.s32.totalorder %s26_s13, 2  ;;  %s35_s14 = sadd.s32 1, %s1651_s8 }
   0x6   : > { %p42_p1 = scmp.ne.s32.totalorder %s1651_s8, %s1647_s7  ;;  %p43_p2 = scmp.eq.s32.totalorder %s1663_s11, 0 }
   0x7   : > { %s3125_s13 = smov (%p28_p0, %s26_s13), 0  ;;  %p48_p4 = scmp.ne.s32.totalorder %s1647_s7, %s1643_s6 }
   0x8   : > { %p1717_p3 = por %p43_p2, %p42_p1  ;;  %s30_s16 = ssub.s32 %s1659_s10, %s3125_s13 }
   0x9   : > { %p49_p5 = scmp.eq.s32.totalorder %s1307_s12, 0  ;;  %p33_p6 = scmp.eq.s32.totalorder %s30_s16, 0 }
   0xa   : > { %p1335_p8 = scmp.lt.s32.totalorder %s1663_s11, 2  ;;  %s98_s19 = sand.u32 1, %s1651_s8  }
   0xb   : > { %p1724_p7 = por %p49_p5, %p48_p4  ;;  %s1322_s20 = sshll.u32 %s1659_s10, 13 }
   0xc   : > { %s1730_s18 = scalar_select %p33_p6, %s1651_s8, %s35_s14  }
   0xd   : > { %s1311_s21 = sshll.u32 %s98_s19, 9  ;;  %s1737_s24 = scalar_lea.hbm %s2825_s0, %s1322_s20 }
   0xe   : > { %s102_s25 = scalar_lea.vmem [#allocation5], %s1311_s21  ;;  %p1741_p9 = pnand %p1335_p8, %p1717_p3 }
   0xf   : > { %s112_s26 = sshll.u32 %s102_s25, 4  ;;  %s1747_s28 = scalar_lea.sflag [#allocation6], %s98_s19  ;;  %s1745_s26 = int_to_ptr.vmem [resolvable:$true] %s112_s26 }
  0x10   : > { %s1583_s29 = scalar_lea.hbm %s1737_s24, 8192  ;;  %p1585_p11 = pneg %p1741_p9 }
  0x11   : > { %p1584_p10 = scmp.ne.s32.totalorder %s1737_s24, %s1583_s29  ;;  %s1588_s3 = scalar_lea.hbm %s2825_s0, 16384 }
  0x12   : > { %p1589_p0 = scmp.lt.u32.totalorder %s1737_s24, %s2825_s0  ;;  %p1590_p1 = scmp.lt.u32.totalorder %s1588_s3, %s1583_s29 }
  0x13   : > { %p1586_p12 = pnand %p1585_p11, %p1584_p10  ;;  %p1592_p3 = scmp.lt.u32.totalorder %s1583_s29, %s1737_s24 }
  0x14   : > { %p1591_p2 = por %p1590_p1, %p1589_p0 }
  0x15   : > { %p1587_p13 = pneg %p1586_p12 }
  0x16   : > { %p1593_p4 = por %p1592_p3, %p1591_p2 }
  0x18   : > { %p1594_p5 = pnand %p1593_p4, %p1587_p13 }
  0x1a   : > { %1597 = shalt.err (!%p1594_p5)
}
  0x1b   : > { %s1598_s6 = scalar_lea.vmem %s1745_s26, 8192  ;;  %s1665_s12 = smov [#allocation5]  }
  0x1c   : > { %p1599_p6 = scmp.ne.s32.totalorder %s1745_s26, %s1598_s6  ;;  %s1603_s14 = sshll.u32 %s1665_s12, 4  ;;  %s1604_s14 = int_to_ptr.vmem [resolvable:$false] %s1603_s14 }
  0x1d   : > { %s1605_s15 = scalar_lea.vmem %s1604_s14, 16384  ;;  %p1606_p12 = scmp.lt.s32.totalorder %s1745_s26, %s1604_s14 }
  0x1e   : > { %p1601_p8 = pnand %p1599_p6, %p1585_p11  ;;  %p1607_p0 = scmp.lt.s32.totalorder %s1605_s15, %s1598_s6 }
  0x20   : > { %p1602_p10 = pneg %p1601_p8  ;;  %p1608_p1 = por %p1607_p0, %p1606_p12 }
  0x22   : > { %p1609_p2 = pnand %p1608_p1, %p1602_p10 }
  0x24   : > { %1612 = shalt.err (!%p1609_p2)
}
  0x25   : > { %s1666_s16 = smov 512   ;;  %s1667_s19 = smov 32  }
  0x26   : > { %1334 = dma.hbm_to_vmem [thread:$0]  (!%p1741_p9), %s1737_s24, 8192, %s1745_s26, %s1747_s28, %s1666_s16, %s1666_s16, %s1667_s19  }
  0x27   : > { %p1315_p11 = scmp.ge.s32.totalorder %s1663_s11, 1  ;;  %p120_p13 = scmp.lt.s32.totalorder %s1663_s11, 3 }
  0x29   : > { %p121_p3 = pnand %p1315_p11, %p120_p13 }
  0x2b   : > { %124 = sbr.rel (%p121_p3) target bundleno = 1146 (0x47a), region = 24 }
  0x32   : > { %s126_s20 = sand.u32 1, %s1647_s7  }
  0x33   : > { %s1316_s21 = sshll.u32 %s126_s20, 9  ;;  %s127_s22 = scalar_lea.sflag [#allocation6], %s126_s20 }
  0x34   : > { %s1778_s23 = scalar_lea.vmem [#allocation5], %s1316_s21 }
  0x35   : > { %1638 = dma.done.wait (%p1724_p7), %s127_s22, 8192  }
  0x36   : > { %1640 = vsyncadd (%p1724_p7), %s127_s22, 4294959104  ;;  %vm2901_vm0 = vcmask 0   ;;  %vm2900_vm1 = vcmask 7168   ;;  %v1668_v0 = vmov 0.0   ;;  %v1669_v1 = vmov -inf   ;;  %v1818_v2 = vld [vmem:[%s1778_s23 + $0x40] sm:$0xff] }
  0x37   : > { %192 = vst.msk [vmem:[#allocation4] sm:$0x1] %vm2901_vm0, %v1668_v0  ;;  %v1821_v3 = vld [vmem:[%s1778_s23 + $0x48] sm:$0xff]  ;;  %v1824_v4 = vld [vmem:[%s1778_s23 + $0x50] sm:$0xff]  ;;  %v1829_v6 = vld [vmem:[%s1778_s23] sm:$0xff]  ;;  %p149_p7 = scmp.lt.s32.totalorder %s1655_s9, 1 }
  0x38   : > { %161 = vst.msk [vmem:[#allocation2 + $0x10] sm:$0xff] %vm2900_vm1, %v1669_v1  ;;  %159 = vst.msk [vmem:[#allocation2] sm:$0xff] %vm2900_vm1, %v1669_v1  ;;  %v283_v5 = vmax.f32 %v1818_v2, %v1821_v3  ;;  %v1832_v7 = vld [vmem:[%s1778_s23 + $0x8] sm:$0xff]  ;;  %v1835_v8 = vld [vmem:[%s1778_s23 + $0x58] sm:$0xff]  ;;  %s2401_s17 = sshll.u32 %s1655_s9, 7 }
  0x39   : > { %160 = vst.msk [vmem:[#allocation2 + $0x8] sm:$0xff] %vm2900_vm1, %v1669_v1  ;;  %162 = vst.msk [vmem:[#allocation2 + $0x18] sm:$0xff] %vm2900_vm1, %v1669_v1  ;;  %v1838_v9 = vld [vmem:[%s1778_s23 + $0x10] sm:$0xff]  ;;  %v273_v10 = vmax.f32 %v1829_v6, %v1832_v7  ;;  %v1843_v11 = vld [vmem:[%s1778_s23 + $0x60] sm:$0xff]  ;;  %p851_p9 = scmp.lt.s32.totalorder %s2401_s17, 512  ;;  %s852_s24 = sadd.s32 128, %s2401_s17 }
  0x3a   : > { %163 = vst.msk [vmem:[#allocation2 + $0x20] sm:$0xff] %vm2900_vm1, %v1669_v1  ;;  %164 = vst.msk [vmem:[#allocation2 + $0x28] sm:$0xff] %vm2900_vm1, %v1669_v1  ;;  %v284_v12 = vmax.f32 %v283_v5, %v1824_v4  ;;  %v1847_v13 = vld [vmem:[%s1778_s23 + $0x18] sm:$0xff]  ;;  %v1850_v14 = vld [vmem:[%s1778_s23 + $0x68] sm:$0xff]  ;;  %s3127_s9 = smov (!%p149_p7, %s1655_s9), 1  ;;  %p1318_p4 = scmp.gt.s32.totalorder %s852_s24, 0 }
  0x3b   : > { %165 = vst.msk [vmem:[#allocation2 + $0x30] sm:$0xff] %vm2900_vm1, %v1669_v1  ;;  %166 = vst.msk [vmem:[#allocation2 + $0x38] sm:$0xff] %vm2900_vm1, %v1669_v1  ;;  %v1853_v15 = vld [vmem:[%s1778_s23 + $0x70] sm:$0xff]  ;;  %v274_v16 = vmax.f32 %v273_v10, %v1838_v9  ;;  %v288_v17 = vmax.f32 %v1843_v11, %v1850_v14  ;;  %v1859_v18 = vld [vmem:[%s1778_s23 + $0x20] sm:$0xff]  ;;  %s151_s27 = scalar_lea.vmem %s2826_s1, %s3127_s9 }
  0x3c   : > { %167 = vst.msk [vmem:[#allocation2 + $0x40] sm:$0xff] %vm2900_vm1, %v1669_v1  ;;  %168 = vst.msk [vmem:[#allocation2 + $0x48] sm:$0xff] %vm2900_vm1, %v1669_v1  ;;  %v1862_v19 = vld [vmem:[%s1778_s23 + $0x28] sm:$0xff]  ;;  %v1865_v20 = vld [vmem:[%s1778_s23 + $0x30] sm:$0xff]  ;;  %v285_v21 = vmax.f32 %v284_v12, %v1835_v8  ;;  %p2412_p5 = pnand %p1318_p4, %p851_p9 }
  0x3d   : > { %169 = vst.msk [vmem:[#allocation2 + $0x50] sm:$0xff] %vm2900_vm1, %v1669_v1  ;;  %170 = vst.msk [vmem:[#allocation2 + $0x58] sm:$0xff] %vm2900_vm1, %v1669_v1  ;;  %v1869_v22 = vld [vmem:[%s1778_s23 + $0x78] sm:$0xff]  ;;  %v278_v23 = vmax.f32 %v1859_v18, %v1862_v19  ;;  %v1874_v24 = vld [vmem:[%s1778_s23 + $0xa0] sm:$0xff]  ;;  %v275_v26 = vmax.f32 %v274_v16, %v1847_v13  ;;  %v289_v27 = vmax.f32 %v288_v17, %v1853_v15 }
  0x3e   : > { %171 = vst.msk [vmem:[#allocation2 + $0x60] sm:$0xff] %vm2900_vm1, %v1669_v1  ;;  %172 = vst.msk [vmem:[#allocation2 + $0x68] sm:$0xff] %vm2900_vm1, %v1669_v1  ;;  %v1877_v25 = vld [vmem:[%s1778_s23 + $0xa8] sm:$0xff]  ;;  %v1882_v28 = vld [vmem:[%s1778_s23 + $0x38] sm:$0xff]  ;;  %286 = vmax.xlane.f32.xlu1 %v285_v21 }
  0x3f   : > { %173 = vst.msk [vmem:[#allocation2 + $0x70] sm:$0xff] %vm2900_vm1, %v1669_v1  ;;  %174 = vst.msk [vmem:[#allocation2 + $0x78] sm:$0xff] %vm2900_vm1, %v1669_v1  ;;  %v1885_v29 = vld [vmem:[%s1778_s23 + $0xb0] sm:$0xff]  ;;  %v298_v30 = vmax.f32 %v1874_v24, %v1877_v25  ;;  %v1890_v31 = vld [vmem:[%s1778_s23 + $0xe0] sm:$0xff]  ;;  %v279_v32 = vmax.f32 %v278_v23, %v1865_v20  ;;  %276 = vmax.xlane.f32.xlu0 %v275_v26  ;;  %v290_v35 = vmax.f32 %v289_v27, %v1869_v22 }
  0x40   : > { %175 = vst.msk [vmem:[#allocation3] sm:$0xff] %vm2900_vm1, %v1668_v0  ;;  %176 = vst.msk [vmem:[#allocation3 + $0x8] sm:$0xff] %vm2900_vm1, %v1668_v0  ;;  %v1894_v33 = vld [vmem:[%s1778_s23 + $0xb8] sm:$0xff]  ;;  %v1897_v34 = vld [vmem:[%s1778_s23 + $0xe8] sm:$0xff] }
  0x41   : > { %177 = vst.msk [vmem:[#allocation3 + $0x10] sm:$0xff] %vm2900_vm1, %v1668_v0  ;;  %178 = vst.msk [vmem:[#allocation3 + $0x18] sm:$0xff] %vm2900_vm1, %v1668_v0  ;;  %v299_v36 = vmax.f32 %v298_v30, %v1885_v29  ;;  %v1902_v37 = vld [vmem:[%s1778_s23 + $0xf0] sm:$0xff]  ;;  %v308_v38 = vmax.f32 %v1890_v31, %v1897_v34  ;;  %v1907_v39 = vld [vmem:[%s1778_s23 + $0x120] sm:$0xff]  ;;  %v280_v41 = vmax.f32 %v279_v32, %v1882_v28 }
  0x42   : > { %179 = vst.msk [vmem:[#allocation3 + $0x20] sm:$0xff] %vm2900_vm1, %v1668_v0  ;;  %180 = vst.msk [vmem:[#allocation3 + $0x28] sm:$0xff] %vm2900_vm1, %v1668_v0  ;;  %v1910_v40 = vld [vmem:[%s1778_s23 + $0x128] sm:$0xff]  ;;  %v1914_v42 = vld [vmem:[%s1778_s23 + $0x80] sm:$0xff]  ;;  %291 = vmax.xlane.f32.xlu1 %v290_v35 }
  0x43   : > { %181 = vst.msk [vmem:[#allocation3 + $0x30] sm:$0xff] %vm2900_vm1, %v1668_v0  ;;  %182 = vst.msk [vmem:[#allocation3 + $0x38] sm:$0xff] %vm2900_vm1, %v1668_v0  ;;  %v1917_v43 = vld [vmem:[%s1778_s23 + $0x88] sm:$0xff]  ;;  %v1920_v44 = vld [vmem:[%s1778_s23 + $0x90] sm:$0xff]  ;;  %v300_v46 = vmax.f32 %v299_v36, %v1894_v33  ;;  %v309_v48 = vmax.f32 %v308_v38, %v1902_v37  ;;  %v318_v49 = vmax.f32 %v1907_v39, %v1910_v40  ;;  %281 = vmax.xlane.f32.xlu0 %v280_v41 }
  0x44   : > { %183 = vst.msk [vmem:[#allocation3 + $0x40] sm:$0xff] %vm2900_vm1, %v1668_v0  ;;  %184 = vst.msk [vmem:[#allocation3 + $0x48] sm:$0xff] %vm2900_vm1, %v1668_v0  ;;  %v293_v45 = vmax.f32 %v1914_v42, %v1917_v43  ;;  %v1926_v47 = vld [vmem:[%s1778_s23 + $0xf8] sm:$0xff]  ;;  %v1935_v51 = vld [vmem:[%s1778_s23 + $0x130] sm:$0xff] }
  0x45   : > { %185 = vst.msk [vmem:[#allocation3 + $0x50] sm:$0xff] %vm2900_vm1, %v1668_v0  ;;  %186 = vst.msk [vmem:[#allocation3 + $0x58] sm:$0xff] %vm2900_vm1, %v1668_v0  ;;  %v1932_v50 = vld [vmem:[%s1778_s23 + $0x98] sm:$0xff]  ;;  %v1939_v53 = vld [vmem:[%s1778_s23 + $0x160] sm:$0xff]  ;;  %v310_v62 = vmax.f32 %v309_v48, %v1926_v47  ;;  %v319_v63 = vmax.f32 %v318_v49, %v1935_v51 }
  0x46   : > { %187 = vst.msk [vmem:[#allocation3 + $0x60] sm:$0xff] %vm2900_vm1, %v1668_v0  ;;  %188 = vst.msk [vmem:[#allocation3 + $0x68] sm:$0xff] %vm2900_vm1, %v1668_v0  ;;  %v294_v52 = vmax.f32 %v293_v45, %v1920_v44  ;;  %v1942_v54 = vld [vmem:[%s1778_s23 + $0x168] sm:$0xff]  ;;  %v1945_v55 = vld [vmem:[%s1778_s23 + $0xc0] sm:$0xff]  ;;  %301 = vmax.xlane.f32.xlu1 %v300_v46 }
  0x47   : > { %189 = vst.msk [vmem:[#allocation3 + $0x70] sm:$0xff] %vm2900_vm1, %v1668_v0  ;;  %190 = vst.msk [vmem:[#allocation3 + $0x78] sm:$0xff] %vm2900_vm1, %v1668_v0  ;;  %v1948_v56 = vld [vmem:[%s1778_s23 + $0xc8] sm:$0xff]  ;;  %v1951_v57 = vld [vmem:[%s1778_s23 + $0x138] sm:$0xff]  ;;  %v328_v0 = vmax.f32 %v1939_v53, %v1942_v54 }
  0x48   : > { %2905 = vst [vmem:[#allocation8_spill] sm:$0xff] %v1829_v6  ;;  %2906 = vst [vmem:[#allocation9_spill] sm:$0xff] %v1832_v7  ;;  %v295_v58 = vmax.f32 %v294_v52, %v1932_v50  ;;  %v1955_v59 = vld [vmem:[%s1778_s23 + $0x170] sm:$0xff]  ;;  %v303_v61 = vmax.f32 %v1945_v55, %v1948_v56  ;;  %v1967_v1 = vld [vmem:[%s1778_s23 + $0x1a0] sm:$0xff]  ;;  %v320_v41 = vmax.f32 %v319_v63, %v1951_v57 }
  0x49   : > { %2907 = vst [vmem:[#allocation10_spill] sm:$0xff] %v1838_v9  ;;  %2908 = vst [vmem:[#allocation11_spill] sm:$0xff] %v1843_v11  ;;  %v1958_v60 = vld [vmem:[%s1778_s23 + $0xd0] sm:$0xff]  ;;  %v1970_v5 = vld [vmem:[%s1778_s23 + $0x1a8] sm:$0xff]  ;;  %v329_v46 = vmax.f32 %v328_v0, %v1955_v59 }
  0x4a   : > { %2909 = vst [vmem:[#allocation12_spill] sm:$0xff] %v1850_v14  ;;  %2910 = vst [vmem:[#allocation13_spill] sm:$0xff] %v1853_v15  ;;  %v1973_v10 = vld [vmem:[%s1778_s23 + $0xd8] sm:$0xff]  ;;  %296 = vmax.xlane.f32.xlu0 %v295_v58  ;;  %v304_v12 = vmax.f32 %v303_v61, %v1958_v60  ;;  %v1977_v16 = vld [vmem:[%s1778_s23 + $0x100] sm:$0xff]  ;;  %311 = vmax.xlane.f32.xlu1 %v310_v62  ;;  %v338_v49 = vmax.f32 %v1967_v1, %v1970_v5 }
  0x4b   : > { %2911 = vst [vmem:[#allocation14_spill] sm:$0xff] %v1869_v22  ;;  %2912 = vst [vmem:[#allocation15_spill] sm:$0xff] %v1874_v24  ;;  %v1980_v17 = vld [vmem:[%s1778_s23 + $0x108] sm:$0xff]  ;;  %v1983_v21 = vld [vmem:[%s1778_s23 + $0x110] sm:$0xff] }
  0x4c   : > { %2913 = vst [vmem:[#allocation16_spill] sm:$0xff] %v1877_v25  ;;  %2914 = vst [vmem:[#allocation17_spill] sm:$0xff] %v1885_v29  ;;  %v313_v23 = vmax.f32 %v1977_v16, %v1980_v17  ;;  %v1988_v26 = vld [vmem:[%s1778_s23 + $0x140] sm:$0xff]  ;;  %v1991_v27 = vld [vmem:[%s1778_s23 + $0x148] sm:$0xff]  ;;  %v305_v30 = vmax.f32 %v304_v12, %v1973_v10 }
  0x4d   : > { %2915 = vst [vmem:[#allocation18_spill] sm:$0xff] %v1894_v33  ;;  %2916 = vst [vmem:[#allocation19_spill] sm:$0xff] %v1902_v37  ;;  %v1995_v32 = vld [vmem:[%s1778_s23 + $0x118] sm:$0xff]  ;;  %v1998_v35 = vld [vmem:[%s1778_s23 + $0x150] sm:$0xff]  ;;  %v323_v36 = vmax.f32 %v1988_v26, %v1991_v27 }
  0x4e   : > { %2917 = vst [vmem:[#allocation20_spill] sm:$0xff] %v1907_v39  ;;  %2918 = vst [vmem:[#allocation21_spill] sm:$0xff] %v1910_v40  ;;  %v2003_v38 = vld [vmem:[%s1778_s23 + $0x180] sm:$0xff]  ;;  %v2007_v45 = vld [vmem:[%s1778_s23 + $0x178] sm:$0xff]  ;;  %v314_v52 = vmax.f32 %v313_v23, %v1983_v21  ;;  %306 = vmax.xlane.f32.xlu0 %v305_v30  ;;  %321 = vmax.xlane.f32.xlu1 %v320_v41 }
  0x4f   : > { %2919 = vst [vmem:[#allocation22_spill] sm:$0xff] %v1914_v42  ;;  %2920 = vst [vmem:[#allocation23_spill] sm:$0xff] %v1917_v43  ;;  %v2011_v48 = vld [vmem:[%s1778_s23 + $0x1b0] sm:$0xff]  ;;  %v2017_v58 = vld [vmem:[%s1778_s23 + $0x188] sm:$0xff]  ;;  %v324_v0 = vmax.f32 %v323_v36, %v1998_v35 }
  0x50   : > { %2921 = vst [vmem:[#allocation24_spill] sm:$0xff] %v1920_v44  ;;  %2922 = vst [vmem:[#allocation25_spill] sm:$0xff] %v1935_v51  ;;  %v2020_v61 = vld [vmem:[%s1778_s23 + $0x1e0] sm:$0xff]  ;;  %v2023_v62 = vld [vmem:[%s1778_s23 + $0x1e8] sm:$0xff]  ;;  %v333_v12 = vmax.f32 %v2003_v38, %v2017_v58 }
  0x51   : > { %2923 = vst [vmem:[#allocation26_spill] sm:$0xff] %v1939_v53  ;;  %2924 = vst [vmem:[#allocation27_spill] sm:$0xff] %v1942_v54  ;;  %v2026_v63 = vld [vmem:[%s1778_s23 + $0x158] sm:$0xff]  ;;  %v2036_v23 = vld [vmem:[%s1778_s23 + $0x1c0] sm:$0xff]  ;;  %v348_v36 = vmax.f32 %v2020_v61, %v2023_v62 }
  0x52   : > { %2925 = vst [vmem:[#allocation28_spill] sm:$0xff] %v1951_v57  ;;  %2926 = vst [vmem:[#allocation29_spill] sm:$0xff] %v1955_v59  ;;  %v2039_v30 = vld [vmem:[%s1778_s23 + $0x1c8] sm:$0xff] }
  0x53   : > { %2927 = vst [vmem:[#allocation30_spill] sm:$0xff] %v1967_v1  ;;  %2928 = vst [vmem:[#allocation31_spill] sm:$0xff] %v1970_v5 }
  0x54   : > { %2929 = vst [vmem:[#allocation32_spill] sm:$0xff] %v1977_v16  ;;  %2930 = vst [vmem:[#allocation33_spill] sm:$0xff] %v1980_v17  ;;  %v339_v17 = vmax.f32 %v338_v49, %v2011_v48  ;;  %v2056_v49 = vld [vmem:[%s1778_s23 + $0x198] sm:$0xff] }
  0x55   : > { %2931 = vst [vmem:[#allocation34_spill] sm:$0xff] %v1983_v21  ;;  %2932 = vst [vmem:[#allocation35_spill] sm:$0xff] %v1988_v26  ;;  %v2033_v26 = vld [vmem:[%s1778_s23 + $0x190] sm:$0xff]  ;;  %v330_v21 = vmax.f32 %v329_v46, %v2007_v45  ;;  %v343_v46 = vmax.f32 %v2036_v23, %v2039_v30 }
  0x56   : > { %2933 = vst [vmem:[#allocation36_spill] sm:$0xff] %v1991_v27  ;;  %2934 = vst [vmem:[#allocation37_spill] sm:$0xff] %v1995_v32  ;;  %v315_v27 = vmax.f32 %v314_v52, %v1995_v32  ;;  %v2046_v52 = vld [vmem:[%s1778_s23 + $0x1b8] sm:$0xff]  ;;  %v334_v41 = vmax.f32 %v333_v12, %v2033_v26  ;;  %v2059_v32 = vld [vmem:[%s1778_s23 + $0x1d0] sm:$0xff] }
  0x57   : > { %2935 = vst [vmem:[#allocation38_spill] sm:$0xff] %v1998_v35  ;;  %2936 = vst [vmem:[#allocation39_spill] sm:$0xff] %v2003_v38  ;;  %v2049_v38 = vld [vmem:[%s1778_s23 + $0x1f0] sm:$0xff]  ;;  %v325_v35 = vmax.f32 %v324_v0, %v2026_v63  ;;  %331 = vmax.xlane.f32.xlu1 %v330_v21  ;;  %v340_v16 = vmax.f32 %v339_v17, %v2046_v52  ;;  %v344_v0 = vmax.f32 %v343_v46, %v2059_v32  ;;  %v2069_v12 = vld [vmem:[%s1778_s23 + $0x1d8] sm:$0xff] }
  0x58   : > { %2937 = vst [vmem:[#allocation40_spill] sm:$0xff] %v2007_v45  ;;  %2938 = vst [vmem:[#allocation41_spill] sm:$0xff] %v2011_v48  ;;  %316 = vmax.xlane.f32.xlu0 %v315_v27  ;;  %v335_v27 = vmax.f32 %v334_v41, %v2056_v49  ;;  %v2073_v17 = vld [vmem:[#allocation2 + $0x10] sm:$0xff]  ;;  %v2075_v21 = vld [vmem:[#allocation2] sm:$0xff] }
  0x59   : > { %2939 = vst [vmem:[#allocation42_spill] sm:$0xff] %v2017_v58  ;;  %2940 = vst [vmem:[#allocation43_spill] sm:$0xff] %v2020_v61  ;;  %v1670_v58 = vmov 0   ;;  %v2064_v61 = vld [vmem:[%s1778_s23 + $0x1f8] sm:$0xff] }
  0x5a   : > { %2941 = vst [vmem:[#allocation44_spill] sm:$0xff] %v2023_v62  ;;  %2942 = vst [vmem:[#allocation45_spill] sm:$0xff] %v2036_v23  ;;  %1389 = vset.pattern.permute.xlu0 %v1670_v58  ;;  %1390 = vset.pattern.permute.xlu1 %v1670_v58  ;;  %v349_v62 = vmax.f32 %v348_v36, %v2049_v38  ;;  %v2156_v23 = vld [vmem:[#allocation2 + $0x58] sm:$0xff] }
  0x5b   : > { %2943 = vst [vmem:[#allocation46_spill] sm:$0xff] %v2039_v30  ;;  %2944 = vst [vmem:[#allocation47_spill] sm:$0xff] %v2046_v52  ;;  %341 = vmax.xlane.f32.xlu1 %v340_v16  ;;  %v345_v30 = vmax.f32 %v344_v0, %v2069_v12  ;;  %v2083_v16 = vld [vmem:[#allocation2 + $0x18] sm:$0xff] }
  0x5c   : > { %2945 = vst [vmem:[#allocation48_spill] sm:$0xff] %v2059_v32  ;;  %326 = vmax.xlane.f32.xlu0 %v325_v35  ;;  %2946 = vst [vmem:[#allocation49_spill] sm:$0xff] %v2069_v12  ;;  %v350_v58 = vmax.f32 %v349_v62, %v2064_v61  ;;  %v2102_v62 = vld [vmem:[#allocation2 + $0x28] sm:$0xff]  ;;  %v2118_v12 = vld [vmem:[#allocation2 + $0x38] sm:$0xff] }
  0x5d   : > { %2947 = vst [vmem:[#allocation50_spill] sm:$0xff] %v2073_v17  ;;  %2948 = vst [vmem:[#allocation51_spill] sm:$0xff] %v2075_v21  ;;  %v2137_v32 = vld [vmem:[#allocation2 + $0x48] sm:$0xff] }
  0x5e   : > { %2951 = vst [vmem:[#allocation54_spill] sm:$0xff] %v2083_v16  ;;  %2955 = vst [vmem:[#allocation58_spill] sm:$0xff] %v2102_v62 }
  0x5f   : > { %351 = vmax.xlane.f32.xlu1 %v350_v58  ;;  %2957 = vst [vmem:[#allocation60_spill] sm:$0xff] %v2118_v12  ;;  %2961 = vst [vmem:[#allocation64_spill] sm:$0xff] %v2137_v32 }
  0x60   : > { %336 = vmax.xlane.f32.xlu0 %v335_v27  ;;  %v2108_v27 = vld [vmem:[#allocation2 + $0x20] sm:$0xff]  ;;  %2965 = vst [vmem:[#allocation68_spill] sm:$0xff] %v2156_v23 }
  0x61   : > { %2956 = vst [vmem:[#allocation59_spill] sm:$0xff] %v2108_v27 }
  0x64   : > { %346 = vmax.xlane.f32.xlu0 %v345_v30  ;;  %v2089_v30 = vld [vmem:[#allocation2 + $0x8] sm:$0xff] }
  0x65   : > { %2952 = vst [vmem:[#allocation55_spill] sm:$0xff] %v2089_v30 }
  0xcb   : > { %v287_v36 = vpop.xlane.xlu1 %286 }
  0xcc   : > { %v2078_v35 = vmax.f32 %v2073_v17, %v287_v36  ;;  %v277_v41 = vpop.xlane.xlu0 %276 }
  0xcd   : > { %v2081_v46 = vmax.f32 %v2075_v21, %v277_v41 }
  0xce   : > { %2949 = vst [vmem:[#allocation52_spill] sm:$0xff] %v2078_v35  ;;  %836 = vst.msk [vmem:[#allocation2 + $0x10] sm:$0xff] %vm2900_vm1, %v2078_v35 }
  0xcf   : > { %2950 = vst [vmem:[#allocation53_spill] sm:$0xff] %v2081_v46  ;;  %834 = vst.msk [vmem:[#allocation2] sm:$0xff] %vm2900_vm1, %v2081_v46  ;;  %371 = vperm.xlu0 %1389, %v2081_v46   ;;  %v292_v0 = vpop.xlane.xlu1 %291  ;;  %v2127_v46 = vld [vmem:[#allocation2 + $0x30] sm:$0xff] }
  0xd0   : > { %v2097_v58 = vmax.f32 %v2083_v16, %v292_v0  ;;  %v282_v36 = vpop.xlane.xlu0 %281  ;;  %2959 = vst [vmem:[#allocation62_spill] sm:$0xff] %v2127_v46 }
  0xd1   : > { %v2100_v41 = vmax.f32 %v2089_v30, %v282_v36 }
  0xd2   : > { %2953 = vst [vmem:[#allocation56_spill] sm:$0xff] %v2097_v58  ;;  %837 = vst.msk [vmem:[#allocation2 + $0x18] sm:$0xff] %vm2900_vm1, %v2097_v58 }
  0xd3   : > { %2954 = vst [vmem:[#allocation57_spill] sm:$0xff] %v2100_v41  ;;  %835 = vst.msk [vmem:[#allocation2 + $0x8] sm:$0xff] %vm2900_vm1, %v2100_v41  ;;  %376 = vperm.xlu1 %1390, %v2100_v41   ;;  %v302_v0 = vpop.xlane.xlu1 %301 }
  0xd4   : > { %v2116_v36 = vmax.f32 %v2102_v62, %v302_v0 }
  0xd6   : > { %839 = vst.msk [vmem:[#allocation2 + $0x28] sm:$0xff] %vm2900_vm1, %v2116_v36 }
  0xd7   : > { %v297_v21 = vpop.xlane.xlu0 %296  ;;  %381 = vperm.xlu1 %1390, %v2078_v35   ;;  %v312_v41 = vpop.xlane.xlu1 %311  ;;  %v2146_v35 = vld [vmem:[#allocation2 + $0x40] sm:$0xff] }
  0xd8   : > { %v2121_v17 = vmax.f32 %v2108_v27, %v297_v21  ;;  %v2135_v21 = vmax.f32 %v2118_v12, %v312_v41  ;;  %2963 = vst [vmem:[#allocation66_spill] sm:$0xff] %v2146_v35  ;;  %v2166_v41 = vld [vmem:[#allocation2 + $0x50] sm:$0xff] }
  0xd9   : > { %2967 = vst [vmem:[#allocation70_spill] sm:$0xff] %v2166_v41 }
  0xda   : > { %2958 = vst [vmem:[#allocation61_spill] sm:$0xff] %v2121_v17  ;;  %838 = vst.msk [vmem:[#allocation2 + $0x20] sm:$0xff] %vm2900_vm1, %v2121_v17 }
  0xdb   : > { %2960 = vst [vmem:[#allocation63_spill] sm:$0xff] %v2135_v21  ;;  %v307_v30 = vpop.xlane.xlu0 %306  ;;  %841 = vst.msk [vmem:[#allocation2 + $0x38] sm:$0xff] %vm2900_vm1, %v2135_v21  ;;  %386 = vperm.xlu1 %1390, %v2097_v58   ;;  %v322_v0 = vpop.xlane.xlu1 %321 }
  0xdc   : > { %v2140_v16 = vmax.f32 %v2127_v46, %v307_v30  ;;  %v2154_v30 = vmax.f32 %v2137_v32, %v322_v0  ;;  %v2176_v32 = vld [vmem:[#allocation2 + $0x68] sm:$0xff]  ;;  %v2186_v46 = vld [vmem:[#allocation2 + $0x60] sm:$0xff] }
  0xdd   : > { %2969 = vst [vmem:[#allocation72_spill] sm:$0xff] %v2176_v32  ;;  %2971 = vst [vmem:[#allocation74_spill] sm:$0xff] %v2186_v46 }
  0xde   : > { %2962 = vst [vmem:[#allocation65_spill] sm:$0xff] %v2140_v16  ;;  %840 = vst.msk [vmem:[#allocation2 + $0x30] sm:$0xff] %vm2900_vm1, %v2140_v16  ;;  %416 = vperm.xlu0 %1389, %v2154_v30  }
  0xdf   : > { %2964 = vst [vmem:[#allocation67_spill] sm:$0xff] %v2154_v30  ;;  %843 = vst.msk [vmem:[#allocation2 + $0x48] sm:$0xff] %vm2900_vm1, %v2154_v30  ;;  %391 = vperm.xlu1 %1390, %v2121_v17  }
  0xe3   : > { %396 = vperm.xlu1 %1390, %v2116_v36  }
  0xe4   : > { %v332_v0 = vpop.xlane.xlu1 %331 }
  0xe5   : > { %v317_v27 = vpop.xlane.xlu0 %316 }
  0xe6   : > { %v2159_v62 = vmax.f32 %v2146_v35, %v317_v27  ;;  %v2174_v27 = vmax.f32 %v2156_v23, %v332_v0  ;;  %v2196_v23 = vld [vmem:[#allocation2 + $0x78] sm:$0xff]  ;;  %v2206_v35 = vld [vmem:[#allocation2 + $0x70] sm:$0xff] }
  0xe7   : > { %2973 = vst [vmem:[#allocation76_spill] sm:$0xff] %v2196_v23  ;;  %2975 = vst [vmem:[#allocation78_spill] sm:$0xff] %v2206_v35  ;;  %401 = vperm.xlu1 %1390, %v2140_v16  }
  0xe8   : > { %2966 = vst [vmem:[#allocation69_spill] sm:$0xff] %v2159_v62  ;;  %842 = vst.msk [vmem:[#allocation2 + $0x40] sm:$0xff] %vm2900_vm1, %v2159_v62  ;;  %426 = vperm.xlu0 %1389, %v2174_v27   ;;  %v342_v0 = vpop.xlane.xlu1 %341 }
  0xe9   : > { %2968 = vst [vmem:[#allocation71_spill] sm:$0xff] %v2174_v27  ;;  %v327_v12 = vpop.xlane.xlu0 %326  ;;  %845 = vst.msk [vmem:[#allocation2 + $0x58] sm:$0xff] %vm2900_vm1, %v2174_v27 }
  0xea   : > { %v2179_v58 = vmax.f32 %v2166_v41, %v327_v12  ;;  %v2194_v12 = vmax.f32 %v2176_v32, %v342_v0 }
  0xeb   : > { %406 = vperm.xlu1 %1390, %v2135_v21  }
  0xec   : > { %2970 = vst [vmem:[#allocation73_spill] sm:$0xff] %v2179_v58  ;;  %844 = vst.msk [vmem:[#allocation2 + $0x50] sm:$0xff] %vm2900_vm1, %v2179_v58  ;;  %436 = vperm.xlu0 %1389, %v2194_v12   ;;  %v352_v0 = vpop.xlane.xlu1 %351 }
  0xed   : > { %2972 = vst [vmem:[#allocation75_spill] sm:$0xff] %v2194_v12  ;;  %v337_v30 = vpop.xlane.xlu0 %336  ;;  %847 = vst.msk [vmem:[#allocation2 + $0x68] sm:$0xff] %vm2900_vm1, %v2194_v12 }
  0xee   : > { %v2199_v17 = vmax.f32 %v2186_v46, %v337_v30  ;;  %v2214_v30 = vmax.f32 %v2196_v23, %v352_v0 }
  0xef   : > { %411 = vperm.xlu1 %1390, %v2159_v62  }
  0xf0   : > { %2974 = vst [vmem:[#allocation77_spill] sm:$0xff] %v2199_v17  ;;  %846 = vst.msk [vmem:[#allocation2 + $0x60] sm:$0xff] %vm2900_vm1, %v2199_v17  ;;  %446 = vperm.xlu0 %1389, %v2214_v30  }
  0xf1   : > { %2976 = vst [vmem:[#allocation79_spill] sm:$0xff] %v2214_v30  ;;  %v347_v27 = vpop.xlane.xlu0 %346  ;;  %849 = vst.msk [vmem:[#allocation2 + $0x78] sm:$0xff] %vm2900_vm1, %v2214_v30 }
  0xf2   : > { %v2217_v32 = vmax.f32 %v2206_v35, %v347_v27 }
  0xf3   : > { %421 = vperm.xlu1 %1390, %v2179_v58  }
  0xf4   : > { %2977 = vst [vmem:[#allocation80_spill] sm:$0xff] %v2217_v32  ;;  %848 = vst.msk [vmem:[#allocation2 + $0x70] sm:$0xff] %vm2900_vm1, %v2217_v32 }
  0xf7   : > { %431 = vperm.xlu1 %1390, %v2199_v17  }
  0xfb   : > { %441 = vperm.xlu1 %1390, %v2217_v32  }
 0x14e   : > { %v372_v27 = vpop.permute.xlu0 %371 }
 0x14f   : > { %v449_v0 = vsub.f32 %v1829_v6, %v372_v27  ;;  %v450_v12 = vsub.f32 %v1832_v7, %v372_v27  ;;  %v451_v30 = vsub.f32 %v1838_v9, %v372_v27  ;;  %v452_v41 = vsub.f32 %v1847_v13, %v372_v27 }
 0x151   : > { %v513_v35 = vmul.f32 1.442695, %v449_v0  ;;  %v515_v23 = vmul.f32 1.442695, %v450_v12  ;;  %v517_v46 = vmul.f32 1.442695, %v451_v30 }
 0x152   : > { %v519_v21 = vmul.f32 1.442695, %v452_v41  ;;  %v377_v62 = vpop.permute.xlu1 %376 }
 0x153   : > { %1391 = vpow2.f32 %v513_v35  ;;  %v453_v58 = vsub.f32 %v1859_v18, %v377_v62  ;;  %v454_v17 = vsub.f32 %v1862_v19, %v377_v62  ;;  %v455_v32 = vsub.f32 %v1865_v20, %v377_v62 }
 0x154   : > { %1393 = vpow2.f32 %v515_v23  ;;  %v456_v6 = vsub.f32 %v1882_v28, %v377_v62 }
 0x155   : > { %1395 = vpow2.f32 %v517_v46  ;;  %v521_v7 = vmul.f32 1.442695, %v453_v58  ;;  %v523_v9 = vmul.f32 1.442695, %v454_v17  ;;  %v525_v16 = vmul.f32 1.442695, %v455_v32 }
 0x156   : > { %1397 = vpow2.f32 %v519_v21  ;;  %v527_v27 = vmul.f32 1.442695, %v456_v6  ;;  %v382_v12 = vpop.permute.xlu1 %381 }
 0x157   : > { %1399 = vpow2.f32 %v521_v7  ;;  %v457_v41 = vsub.f32 %v1818_v2, %v382_v12  ;;  %v458_v35 = vsub.f32 %v1821_v3, %v382_v12  ;;  %v459_v30 = vsub.f32 %v1824_v4, %v382_v12 }
 0x158   : > { %1401 = vpow2.f32 %v523_v9  ;;  %v460_v0 = vsub.f32 %v1835_v8, %v382_v12 }
 0x159   : > { %1403 = vpow2.f32 %v525_v16  ;;  %v529_v23 = vmul.f32 1.442695, %v457_v41  ;;  %v531_v62 = vmul.f32 1.442695, %v458_v35  ;;  %v533_v46 = vmul.f32 1.442695, %v459_v30 }
 0x15a   : > { %1405 = vpow2.f32 %v527_v27  ;;  %v535_v17 = vmul.f32 1.442695, %v460_v0  ;;  %v387_v32 = vpop.permute.xlu1 %386 }
 0x15b   : > { %1407 = vpow2.f32 %v529_v23  ;;  %v461_v6 = vsub.f32 %v1843_v11, %v387_v32  ;;  %v462_v7 = vsub.f32 %v1850_v14, %v387_v32  ;;  %v463_v58 = vsub.f32 %v1853_v15, %v387_v32 }
 0x15c   : > { %1409 = vpow2.f32 %v531_v62  ;;  %v464_v21 = vsub.f32 %v1869_v22, %v387_v32 }
 0x15d   : > { %v1392_v9 = vpop.eup %1391  ;;  %1411 = vpow2.f32 %v533_v46  ;;  %v537_v12 = vmul.f32 1.442695, %v461_v6  ;;  %v539_v16 = vmul.f32 1.442695, %v462_v7  ;;  %v541_v41 = vmul.f32 1.442695, %v463_v58  ;;  %v417_v35 = vpop.permute.xlu0 %416 }
 0x15e   : > { %v1394_v30 = vpop.eup %1393  ;;  %1413 = vpow2.f32 %v535_v17  ;;  %v543_v27 = vmul.f32 1.442695, %v464_v21  ;;  %v392_v0 = vpop.permute.xlu1 %391  ;;  %v485_v23 = vsub.f32 %v1907_v39, %v417_v35  ;;  %v486_v6 = vsub.f32 %v1910_v40, %v417_v35 }
 0x15f   : > { %v1396_v11 = vpop.eup %1395  ;;  %1415 = vpow2.f32 %v537_v12  ;;  %v465_v14 = vsub.f32 %v1914_v42, %v392_v0  ;;  %v466_v62 = vsub.f32 %v1917_v43, %v392_v0  ;;  %v467_v32 = vsub.f32 %v1920_v44, %v392_v0 }
 0x160   : > { %v1398_v22 = vpop.eup %1397  ;;  %1417 = vpow2.f32 %v539_v16  ;;  %v468_v46 = vsub.f32 %v1932_v50, %v392_v0  ;;  %v487_v17 = vsub.f32 %v1935_v51, %v417_v35  ;;  %v488_v43 = vsub.f32 %v1951_v57, %v417_v35 }
 0x161   : > { %v2256_v7 = vpop.eup %1399  ;;  %1419 = vpow2.f32 %v541_v41  ;;  %v545_v58 = vmul.f32 1.442695, %v465_v14  ;;  %v547_v21 = vmul.f32 1.442695, %v466_v62  ;;  %v549_v12 = vmul.f32 1.442695, %v467_v32 }
 0x162   : > { %v1402_v39 = vpop.eup %1401  ;;  %1421 = vpow2.f32 %v543_v27  ;;  %v551_v42 = vmul.f32 1.442695, %v468_v46  ;;  %v397_v44 = vpop.permute.xlu1 %396  ;;  %v585_v16 = vmul.f32 1.442695, %v485_v23  ;;  %v587_v51 = vmul.f32 1.442695, %v486_v6 }
 0x163   : > { %v2259_v15 = vpop.eup %1403  ;;  %1423 = vpow2.f32 %v545_v58  ;;  %v469_v0 = vsub.f32 %v1874_v24, %v397_v44  ;;  %v470_v14 = vsub.f32 %v1877_v25, %v397_v44  ;;  %v589_v27 = vmul.f32 1.442695, %v487_v17 }
 0x164   : > { %v2262_v40 = vpop.eup %1405  ;;  %1425 = vpow2.f32 %v547_v21  ;;  %v471_v35 = vsub.f32 %v1885_v29, %v397_v44  ;;  %v591_v46 = vmul.f32 1.442695, %v488_v43  ;;  %v472_v23 = vsub.f32 %v1894_v33, %v397_v44 }
 0x165   : > { %v2265_v62 = vpop.eup %1407  ;;  %1427 = vpow2.f32 %v549_v12  ;;  %v553_v6 = vmul.f32 1.442695, %v469_v0  ;;  %v555_v12 = vmul.f32 1.442695, %v470_v14  ;;  %v721_v29 = vadd.f32 %v1394_v30, %v1392_v9 }
 0x166   : > { %v2268_v32 = vpop.eup %1409  ;;  %1429 = vpow2.f32 %v551_v42  ;;  %v402_v58 = vpop.permute.xlu1 %401  ;;  %v557_v42 = vmul.f32 1.442695, %v471_v35 }
 0x167   : > { %v427_v41 = vpop.permute.xlu0 %426  ;;  %v2271_v57 = vpop.eup %1411  ;;  %1431 = vpow2.f32 %v585_v16  ;;  %v559_v16 = vmul.f32 1.442695, %v472_v23  ;;  %v473_v14 = vsub.f32 %v1945_v55, %v402_v58 }
 0x168   : > { %v493_v21 = vsub.f32 %v1939_v53, %v427_v41  ;;  %v2274_v25 = vpop.eup %1413  ;;  %1433 = vpow2.f32 %v587_v51  ;;  %v494_v17 = vsub.f32 %v1942_v54, %v427_v41  ;;  %v495_v43 = vsub.f32 %v1955_v59, %v427_v41 }
 0x169   : > { %v2277_v24 = vpop.eup %1415  ;;  %1435 = vpow2.f32 %v589_v27  ;;  %v496_v0 = vsub.f32 %v2007_v45, %v427_v41  ;;  %v722_v53 = vadd.f32 %v1396_v11, %v721_v29  ;;  %v474_v59 = vsub.f32 %v1948_v56, %v402_v58 }
 0x16a   : > { %v2280_v44 = vpop.eup %1417  ;;  %1437 = vpow2.f32 %v591_v46  ;;  %v601_v51 = vmul.f32 1.442695, %v493_v21  ;;  %v2286_v9 = vpop.permute.xlu1 %406  ;;  %v603_v27 = vmul.f32 1.442695, %v494_v17  ;;  %v605_v11 = vmul.f32 1.442695, %v495_v43 }
 0x16b   : > { %v2283_v33 = vpop.eup %1419  ;;  %1439 = vpow2.f32 %v553_v6  ;;  %v723_v35 = vadd.f32 %v1398_v22, %v722_v53  ;;  %v437_v46 = vpop.permute.xlu0 %436  ;;  %v475_v29 = vsub.f32 %v1958_v60, %v402_v58  ;;  %v607_v6 = vmul.f32 1.442695, %v496_v0 }
 0x16c   : > { %v2288_v30 = vpop.eup %1421  ;;  %1441 = vpow2.f32 %v555_v12  ;;  %v476_v21 = vsub.f32 %v1973_v10, %v402_v58  ;;  %v726_v12 = vadd.f32 %v1402_v39, %v2256_v7  ;;  %v561_v22 = vmul.f32 1.442695, %v473_v14 }
 0x16d   : > { %v2291_v23 = vpop.eup %1423  ;;  %1443 = vpow2.f32 %v557_v42  ;;  %724 = vadd.xlane.f32.xlu1 %v723_v35  ;;  %v501_v53 = vsub.f32 %v1967_v1, %v437_v46  ;;  %v563_v42 = vmul.f32 1.442695, %v474_v59  ;;  %v502_v43 = vsub.f32 %v1970_v5, %v437_v46  ;;  %v2978_v5 = vld [vmem:[#allocation43_spill] sm:$0xff] }
 0x16e   : > { %v2294_v41 = vpop.eup %1425  ;;  %1445 = vpow2.f32 %v559_v16  ;;  %v727_v16 = vadd.f32 %v2259_v15, %v726_v12  ;;  %v565_v58 = vmul.f32 1.442695, %v475_v29  ;;  %v503_v39 = vsub.f32 %v2011_v48, %v437_v46  ;;  %v2308_v7 = vpop.permute.xlu1 %411 }
 0x16f   : > { %v2298_v17 = vpop.eup %1427  ;;  %1447 = vpow2.f32 %v601_v51  ;;  %v567_v14 = vmul.f32 1.442695, %v476_v21  ;;  %v504_v35 = vsub.f32 %v2046_v52, %v437_v46  ;;  %v617_v15 = vmul.f32 1.442695, %v501_v53  ;;  %v447_v21 = vpop.permute.xlu0 %446 }
 0x170   : > { %v2301_v45 = vpop.eup %1429  ;;  %1449 = vpow2.f32 %v603_v27  ;;  %v728_v59 = vadd.f32 %v2262_v40, %v727_v16  ;;  %v619_v12 = vmul.f32 1.442695, %v502_v43  ;;  %v731_v46 = vadd.f32 %v2268_v32, %v2265_v62  ;;  %v2979_v62 = vld [vmem:[#allocation44_spill] sm:$0xff] }
 0x171   : > { %v2305_v0 = vpop.eup %1431  ;;  %1451 = vpow2.f32 %v605_v11  ;;  %v477_v11 = vsub.f32 %v1890_v31, %v2286_v9  ;;  %v621_v16 = vmul.f32 1.442695, %v503_v39  ;;  %v480_v53 = vsub.f32 %v1926_v47, %v2286_v9 }
 0x172   : > { %v2310_v51 = vpop.eup %1433  ;;  %1453 = vpow2.f32 %v607_v6  ;;  %729 = vadd.xlane.f32.xlu0 %v728_v59  ;;  %v478_v6 = vsub.f32 %v1897_v34, %v2286_v9  ;;  %v732_v43 = vadd.f32 %v2271_v57, %v731_v46  ;;  %v509_v1 = vsub.f32 %v2978_v5, %v447_v21 }
 0x173   : > { %v2314_v27 = vpop.eup %1435  ;;  %1455 = vpow2.f32 %v561_v22  ;;  %v479_v22 = vsub.f32 %v1902_v37, %v2286_v9  ;;  %v569_v48 = vmul.f32 1.442695, %v477_v11  ;;  %v510_v32 = vsub.f32 %v2979_v62, %v447_v21 }
 0x174   : > { %v2318_v29 = vpop.eup %1437  ;;  %1457 = vpow2.f32 %v563_v42  ;;  %v623_v42 = vmul.f32 1.442695, %v504_v35  ;;  %v571_v54 = vmul.f32 1.442695, %v478_v6  ;;  %v733_v37 = vadd.f32 %v2274_v25, %v732_v43 }
 0x175   : > { %v1440_v40 = vpop.eup %1439  ;;  %1459 = vpow2.f32 %v565_v58  ;;  %v2331_v58 = vpop.permute.xlu1 %421  ;;  %v736_v9 = vadd.f32 %v2280_v44, %v2277_v24  ;;  %v573_v57 = vmul.f32 1.442695, %v479_v22  ;;  %v575_v35 = vmul.f32 1.442695, %v480_v53  ;;  %v2981_v53 = vld [vmem:[#allocation33_spill] sm:$0xff] }
 0x176   : > { %v1442_v52 = vpop.eup %1441  ;;  %1461 = vpow2.f32 %v567_v14  ;;  %v512_v11 = vsub.f32 %v2064_v61, %v447_v21  ;;  %734 = vadd.xlane.f32.xlu0 %v733_v37  ;;  %v633_v24 = vmul.f32 1.442695, %v509_v1  ;;  %v635_v44 = vmul.f32 1.442695, %v510_v32  ;;  %v2982_v37 = vld [vmem:[#allocation34_spill] sm:$0xff] }
 0x177   : > { %v1444_v59 = vpop.eup %1443  ;;  %1463 = vpow2.f32 %v617_v15  ;;  %v511_v15 = vsub.f32 %v2049_v38, %v447_v21  ;;  %v737_v25 = vadd.f32 %v2283_v33, %v736_v9  ;;  %v482_v21 = vsub.f32 %v2981_v53, %v2308_v7  ;;  %v2984_v53 = vld [vmem:[#allocation35_spill] sm:$0xff] }
 0x178   : > { %v1446_v39 = vpop.eup %1445  ;;  %1465 = vpow2.f32 %v619_v12  ;;  %v2980_v12 = vld [vmem:[#allocation32_spill] sm:$0xff] }
 0x179   : > { %v2336_v14 = vpop.eup %1447  ;;  %1467 = vpow2.f32 %v621_v16  ;;  %v481_v6 = vsub.f32 %v2980_v12, %v2308_v7  ;;  %v741_v16 = vadd.f32 %v2294_v41, %v2291_v23  ;;  %v738_v43 = vadd.f32 %v2288_v30, %v737_v25 }
 0x17a   : > { %v2339_v5 = vpop.eup %1449  ;;  %1469 = vpow2.f32 %v623_v42  ;;  %v483_v42 = vsub.f32 %v2982_v37, %v2308_v7  ;;  %v637_v62 = vmul.f32 1.442695, %v511_v15  ;;  %v639_v23 = vmul.f32 1.442695, %v512_v11 }
 0x17b   : > { %v2345_v46 = vpop.eup %1451  ;;  %1471 = vpow2.f32 %v569_v48  ;;  %v742_v1 = vadd.f32 %v2298_v17, %v741_v16  ;;  %v2357_v48 = vpop.permute.xlu1 %431  ;;  %v577_v9 = vmul.f32 1.442695, %v481_v6  ;;  %739 = vadd.xlane.f32.xlu1 %v738_v43  ;;  %v489_v30 = vsub.f32 %v2984_v53, %v2331_v58 }
 0x17c   : > { %v2349_v22 = vpop.eup %1453  ;;  %1473 = vpow2.f32 %v571_v54  ;;  %v2983_v54 = vld [vmem:[#allocation37_spill] sm:$0xff]  ;;  %v746_v15 = vadd.f32 %v1442_v52, %v1440_v40  ;;  %v579_v17 = vmul.f32 1.442695, %v482_v21  ;;  %v581_v16 = vmul.f32 1.442695, %v483_v42  ;;  %v2987_v42 = vld [vmem:[#allocation39_spill] sm:$0xff] }
 0x17d   : > { %v1456_v33 = vpop.eup %1455  ;;  %1475 = vpow2.f32 %v573_v57  ;;  %v484_v41 = vsub.f32 %v2983_v54, %v2308_v7  ;;  %v743_v57 = vadd.f32 %v2301_v45, %v742_v1  ;;  %v2986_v7 = vld [vmem:[#allocation38_spill] sm:$0xff]  ;;  %v593_v21 = vmul.f32 1.442695, %v489_v30  ;;  %v2989_v30 = vld [vmem:[#allocation45_spill] sm:$0xff] }
 0x17e   : > { %v1458_v32 = vpop.eup %1457  ;;  %1477 = vpow2.f32 %v575_v35  ;;  %v2985_v35 = vld [vmem:[#allocation36_spill] sm:$0xff]  ;;  %v491_v6 = vsub.f32 %v2986_v7, %v2331_v58  ;;  %v747_v43 = vadd.f32 %v1444_v59, %v746_v15  ;;  %v497_v1 = vsub.f32 %v2987_v42, %v2357_v48 }
 0x17f   : > { %v1460_v12 = vpop.eup %1459  ;;  %1479 = vpow2.f32 %v633_v24  ;;  %v490_v11 = vsub.f32 %v2985_v35, %v2331_v58  ;;  %v492_v24 = vsub.f32 %v2026_v63, %v2331_v58  ;;  %744 = vadd.xlane.f32.xlu0 %v743_v57  ;;  %v583_v52 = vmul.f32 1.442695, %v484_v41  ;;  %v442_v54 = vpop.permute.xlu1 %441  ;;  %v2988_v58 = vld [vmem:[#allocation42_spill] sm:$0xff] }
 0x180   : > { %v1462_v25 = vpop.eup %1461  ;;  %1481 = vpow2.f32 %v635_v44  ;;  %v751_v40 = vadd.f32 %v1458_v32, %v1456_v33  ;;  %v498_v59 = vsub.f32 %v2988_v58, %v2357_v48  ;;  %v597_v33 = vmul.f32 1.442695, %v491_v6  ;;  %v2991_v58 = vld [vmem:[#allocation48_spill] sm:$0xff] }
 0x181   : > { %v2366_v37 = vpop.eup %1463  ;;  %1483 = vpow2.f32 %v637_v62  ;;  %v748_v62 = vadd.f32 %v1446_v39, %v747_v43  ;;  %v595_v35 = vmul.f32 1.442695, %v490_v11  ;;  %v599_v32 = vmul.f32 1.442695, %v492_v24  ;;  %v2990_v43 = vld [vmem:[#allocation46_spill] sm:$0xff] }
 0x182   : > { %v1466_v45 = vpop.eup %1465  ;;  %1485 = vpow2.f32 %v639_v23  ;;  %v752_v57 = vadd.f32 %v1460_v12, %v751_v40  ;;  %v499_v41 = vsub.f32 %v2033_v26, %v2357_v48  ;;  %v500_v39 = vsub.f32 %v2056_v49, %v2357_v48 }
 0x183   : > { %v2372_v44 = vpop.eup %1467  ;;  %1487 = vpow2.f32 %v577_v9  ;;  %749 = vadd.xlane.f32.xlu1 %v748_v62  ;;  %v505_v15 = vsub.f32 %v2989_v30, %v442_v54  ;;  %v609_v7 = vmul.f32 1.442695, %v497_v1  ;;  %v611_v24 = vmul.f32 1.442695, %v498_v59  ;;  %v2992_v59 = vld [vmem:[#allocation49_spill] sm:$0xff] }
 0x184   : > { %v2376_v53 = vpop.eup %1469  ;;  %1489 = vpow2.f32 %v579_v17  ;;  %v753_v17 = vadd.f32 %v1462_v25, %v752_v57  ;;  %v506_v40 = vsub.f32 %v2990_v43, %v442_v54  ;;  %v613_v42 = vmul.f32 1.442695, %v499_v41 }
 0x185   : > { %v1472_v23 = vpop.eup %1471  ;;  %1491 = vpow2.f32 %v581_v16  ;;  %v766_v16 = vadd.f32 %v2310_v51, %v2305_v0  ;;  %v615_v25 = vmul.f32 1.442695, %v500_v39  ;;  %v625_v1 = vmul.f32 1.442695, %v505_v15 }
 0x186   : > { %v1474_v9 = vpop.eup %1473  ;;  %1493 = vpow2.f32 %v583_v52  ;;  %754 = vadd.xlane.f32.xlu0 %v753_v17  ;;  %v776_v51 = vadd.f32 %v2339_v5, %v2336_v14  ;;  %v627_v41 = vmul.f32 1.442695, %v506_v40  ;;  %v786_v30 = vadd.f32 %v1466_v45, %v2366_v37 }
 0x187   : > { %v1476_v11 = vpop.eup %1475  ;;  %1495 = vpow2.f32 %v593_v21  ;;  %v756_v12 = vadd.f32 %v1474_v9, %v1472_v23  ;;  %v507_v21 = vsub.f32 %v2991_v58, %v442_v54  ;;  %v767_v0 = vadd.f32 %v2314_v27, %v766_v16 }
 0x188   : > { %v1478_v6 = vpop.eup %1477  ;;  %1497 = vpow2.f32 %v595_v35  ;;  %v777_v14 = vadd.f32 %v2345_v46, %v776_v51  ;;  %v787_v16 = vadd.f32 %v2372_v44, %v786_v30  ;;  %v2998_v30 = vld [vmem:[#allocation57_spill] sm:$0xff] }
 0x189   : > { %v1480_v52 = vpop.eup %1479  ;;  %1499 = vpow2.f32 %v597_v33  ;;  %v757_v48 = vadd.f32 %v1476_v11, %v756_v12  ;;  %v508_v33 = vsub.f32 %v2992_v59, %v442_v54  ;;  %v629_v39 = vmul.f32 1.442695, %v507_v21 }
 0x18a   : > { %v1482_v62 = vpop.eup %1481  ;;  %1501 = vpow2.f32 %v599_v32  ;;  %v768_v27 = vadd.f32 %v2318_v29, %v767_v0  ;;  %v778_v45 = vadd.f32 %v2349_v22, %v777_v14  ;;  %v788_v21 = vadd.f32 %v2376_v53, %v787_v16  ;;  %v2994_v53 = vld [vmem:[#allocation51_spill] sm:$0xff]  ;;  %v3001_v14 = vld [vmem:[#allocation52_spill] sm:$0xff] }
 0x18b   : > { %v1484_v57 = vpop.eup %1483  ;;  %1503 = vpow2.f32 %v609_v7  ;;  %v758_v23 = vadd.f32 %v1478_v6, %v757_v48  ;;  %v631_v11 = vmul.f32 1.442695, %v508_v33  ;;  %v796_v43 = vadd.f32 %v1482_v62, %v1480_v52  ;;  %v3004_v16 = vld [vmem:[#allocation56_spill] sm:$0xff] }
 0x18c   : > { %v1486_v35 = vpop.eup %1485  ;;  %1505 = vpow2.f32 %v611_v24 }
 0x18d   : > { %v1488_v9 = vpop.eup %1487  ;;  %1507 = vpow2.f32 %v613_v42  ;;  %759 = vadd.xlane.f32.xlu1 %v758_v23 }
 0x18e   : > { %v1490_v32 = vpop.eup %1489  ;;  %1509 = vpow2.f32 %v615_v25 }
 0x18f   : > { %v1492_v15 = vpop.eup %1491  ;;  %1511 = vpow2.f32 %v625_v1  ;;  %v761_v17 = vadd.f32 %v1490_v32, %v1488_v9  ;;  %v797_v1 = vadd.f32 %v1484_v57, %v796_v43  ;;  %v2995_v57 = vld [vmem:[#allocation53_spill] sm:$0xff]  ;;  %v3006_v43 = vld [vmem:[#allocation59_spill] sm:$0xff] }
 0x190   : > { %v1494_v5 = vpop.eup %1493  ;;  %1513 = vpow2.f32 %v627_v41 }
 0x191   : > { %v1496_v54 = vpop.eup %1495  ;;  %v762_v7 = vadd.f32 %v1492_v15, %v761_v17  ;;  %769 = vadd.xlane.f32.xlu1 %v768_v27  ;;  %1515 = vpow2.f32 %v629_v39  ;;  %v798_v51 = vadd.f32 %v1486_v35, %v797_v1  ;;  %v2996_v35 = vsub.f32 %v2994_v53, %v2995_v57  ;;  %v2997_v39 = vld [vmem:[#allocation55_spill] sm:$0xff]  ;;  %v3000_v27 = vld [vmem:[#allocation50_spill] sm:$0xff] }
 0x192   : > { %v1498_v12 = vpop.eup %1497  ;;  %1517 = vpow2.f32 %v631_v11  ;;  %v2999_v15 = vsub.f32 %v2997_v39, %v2998_v30  ;;  %v644_v57 = vld [vmem:[#allocation3 + $0x18] sm:$0xff] }
 0x193   : > { %v1500_v6 = vpop.eup %1499  ;;  %v763_v24 = vadd.f32 %v1494_v5, %v762_v7  ;;  %v771_v37 = vadd.f32 %v1498_v12, %v1496_v54  ;;  %v673_v32 = vmul.f32 1.442695, %v2996_v35  ;;  %v3002_v5 = vsub.f32 %v3000_v27, %v3001_v14  ;;  %v641_v7 = vld [vmem:[#allocation3] sm:$0xff]  ;;  %v3003_v12 = vld [vmem:[#allocation54_spill] sm:$0xff] }
 0x194   : > { %v1502_v40 = vpop.eup %1501  ;;  %v675_v17 = vmul.f32 1.442695, %v2999_v15  ;;  %v3015_v35 = vld [vmem:[#allocation63_spill] sm:$0xff] }
 0x195   : > { %v1504_v29 = vpop.eup %1503  ;;  %764 = vadd.xlane.f32.xlu0 %v763_v24  ;;  %v772_v46 = vadd.f32 %v1500_v6, %v771_v37  ;;  %779 = vadd.xlane.f32.xlu1 %v778_v45  ;;  %1519 = vpow2.f32 %v673_v32  ;;  %v677_v11 = vmul.f32 1.442695, %v3002_v5  ;;  %v3005_v6 = vsub.f32 %v3003_v12, %v3004_v16  ;;  %v645_v27 = vld [vmem:[#allocation3 + $0x20] sm:$0xff] }
 0x196   : > { %v1506_v42 = vpop.eup %1505  ;;  %1521 = vpow2.f32 %v675_v17  ;;  %v3017_v5 = vld [vmem:[#allocation64_spill] sm:$0xff] }
 0x197   : > { %v1508_v48 = vpop.eup %1507  ;;  %v773_v25 = vadd.f32 %v1502_v40, %v772_v46  ;;  %v781_v58 = vadd.f32 %v1506_v42, %v1504_v29  ;;  %1523 = vpow2.f32 %v677_v11  ;;  %v679_v24 = vmul.f32 1.442695, %v3005_v6  ;;  %v3007_v40 = vld [vmem:[#allocation61_spill] sm:$0xff]  ;;  %v3018_v11 = vld [vmem:[#allocation67_spill] sm:$0xff] }
 0x198   : > { %v1510_v44 = vpop.eup %1509  ;;  %v3008_v29 = vsub.f32 %v3006_v43, %v3007_v40  ;;  %v3021_v43 = vld [vmem:[#allocation69_spill] sm:$0xff] }
 0x199   : > { %v1512_v23 = vpop.eup %1511  ;;  %774 = vadd.xlane.f32.xlu0 %v773_v25  ;;  %v782_v22 = vadd.f32 %v1508_v48, %v781_v58  ;;  %789 = vadd.xlane.f32.xlu1 %v788_v21  ;;  %1525 = vpow2.f32 %v679_v24  ;;  %v642_v25 = vld [vmem:[#allocation3 + $0x8] sm:$0xff]  ;;  %v3009_v58 = vld [vmem:[#allocation58_spill] sm:$0xff] }
 0x19a   : > { %v1514_v52 = vpop.eup %1513  ;;  %v681_v46 = vmul.f32 1.442695, %v3008_v29  ;;  %v3010_v21 = vsub.f32 %v3009_v58, %v2116_v36  ;;  %v3014_v36 = vld [vmem:[#allocation60_spill] sm:$0xff] }
 0x19b   : > { %v783_v62 = vadd.f32 %v1510_v44, %v782_v22  ;;  %v791_v0 = vadd.f32 %v1514_v52, %v1512_v23  ;;  %v1516_v59 = vpop.eup %1515  ;;  %v3016_v32 = vsub.f32 %v3014_v36, %v3015_v35 }
 0x19c   : > { %v1518_v41 = vpop.eup %1517  ;;  %v683_v1 = vmul.f32 1.442695, %v3010_v21  ;;  %1527 = vpow2.f32 %v681_v46 }
 0x19d   : > { %784 = vadd.xlane.f32.xlu0 %v783_v62  ;;  %v792_v33 = vadd.f32 %v1516_v59, %v791_v0  ;;  %799 = vadd.xlane.f32.xlu1 %v798_v51  ;;  %v3011_v62 = vld [vmem:[#allocation62_spill] sm:$0xff]  ;;  %v3012_v0 = vld [vmem:[#allocation65_spill] sm:$0xff]  ;;  %v687_v39 = vmul.f32 1.442695, %v3016_v32 }
 0x19e   : > { %v3013_v51 = vsub.f32 %v3011_v62, %v3012_v0  ;;  %1529 = vpow2.f32 %v683_v1  ;;  %v648_v32 = vld [vmem:[#allocation3 + $0x38] sm:$0xff] }
 0x19f   : > { %v793_v9 = vadd.f32 %v1518_v41, %v792_v33  ;;  %v1520_v54 = vpop.eup %1519  ;;  %v643_v33 = vld [vmem:[#allocation3 + $0x10] sm:$0xff] }
 0x1a0   : > { %v705_v37 = vmul.f32 %v1520_v54, %v641_v7  ;;  %v1522_v48 = vpop.eup %1521  ;;  %v685_v59 = vmul.f32 1.442695, %v3013_v51  ;;  %v3019_v54 = vsub.f32 %v3017_v5, %v3018_v11 }
 0x1a1   : > { %794 = vadd.xlane.f32.xlu0 %v793_v9  ;;  %v706_v44 = vmul.f32 %v1522_v48, %v642_v25  ;;  %v1524_v52 = vpop.eup %1523  ;;  %v3024_v48 = vld [vmem:[#allocation71_spill] sm:$0xff] }
 0x1a2   : > { %v707_v41 = vmul.f32 %v1524_v52, %v643_v33  ;;  %1531 = vpow2.f32 %v685_v59  ;;  %v691_v7 = vmul.f32 1.442695, %v3019_v54  ;;  %v3027_v52 = vld [vmem:[#allocation73_spill] sm:$0xff]  ;;  %v3029_v59 = vld [vmem:[#allocation72_spill] sm:$0xff]  ;;  %v3030_v33 = vld [vmem:[#allocation75_spill] sm:$0xff] }
 0x1a3   : > { %v1526_v9 = vpop.eup %1525  ;;  %1533 = vpow2.f32 %v687_v39  ;;  %v3032_v39 = vld [vmem:[#allocation74_spill] sm:$0xff] }
 0x1a4   : > { %v708_v17 = vmul.f32 %v1526_v9, %v644_v57  ;;  %1535 = vpow2.f32 %v691_v7 }
 0x1a6   : > { %v1528_v15 = vpop.eup %1527 }
 0x1a7   : > { %v709_v16 = vmul.f32 %v1528_v15, %v645_v27  ;;  %v3035_v27 = vld [vmem:[#allocation76_spill] sm:$0xff] }
 0x1a8   : > { %v1530_v6 = vpop.eup %1529 }
 0x1ac   : > { %v1532_v21 = vpop.eup %1531 }
 0x1ad   : > { %v1534_v36 = vpop.eup %1533 }
 0x1ae   : > { %v712_v54 = vmul.f32 %v1534_v36, %v648_v32  ;;  %v1536_v7 = vpop.eup %1535  ;;  %v656_v32 = vld [vmem:[#allocation3 + $0x78] sm:$0xff] }
 0x1fa   : > { %v725_v45 = vpop.xlane.xlu1 %724 }
 0x1fb   : > { %v801_v42 = vadd.f32 %v725_v45, %v705_v37  ;;  %v646_v37 = vld [vmem:[#allocation3 + $0x28] sm:$0xff]  ;;  %v3020_v45 = vld [vmem:[#allocation66_spill] sm:$0xff] }
 0x1fc   : > { %v3022_v40 = vsub.f32 %v3020_v45, %v3021_v43  ;;  %v710_v1 = vmul.f32 %v1530_v6, %v646_v37  ;;  %v3039_v37 = vld [vmem:[#allocation80_spill] sm:$0xff] }
 0x1fd   : > { %818 = vst.msk [vmem:[#allocation3] sm:$0xff] %vm2900_vm1, %v801_v42  ;;  %v3023_v42 = vld [vmem:[#allocation68_spill] sm:$0xff] }
 0x1fe   : > { %v689_v29 = vmul.f32 1.442695, %v3022_v40  ;;  %v3025_v25 = vsub.f32 %v3023_v42, %v3024_v48  ;;  %v649_v48 = vld [vmem:[#allocation3 + $0x40] sm:$0xff] }
 0x1ff   : > { %v730_v23 = vpop.xlane.xlu0 %729 }
 0x200   : > { %v802_v22 = vadd.f32 %v730_v23, %v706_v44  ;;  %v695_v58 = vmul.f32 1.442695, %v3025_v25  ;;  %v647_v44 = vld [vmem:[#allocation3 + $0x30] sm:$0xff]  ;;  %1537 = vpow2.f32 %v689_v29  ;;  %v652_v25 = vld [vmem:[#allocation3 + $0x58] sm:$0xff] }
 0x202   : > { %819 = vst.msk [vmem:[#allocation3 + $0x8] sm:$0xff] %vm2900_vm1, %v802_v22  ;;  %v3026_v22 = vld [vmem:[#allocation70_spill] sm:$0xff]  ;;  %1539 = vpow2.f32 %v695_v58 }
 0x203   : > { %v735_v53 = vpop.xlane.xlu0 %734  ;;  %v3028_v62 = vsub.f32 %v3026_v22, %v3027_v52 }
 0x204   : > { %v803_v30 = vadd.f32 %v735_v53, %v707_v41  ;;  %v3031_v41 = vsub.f32 %v3029_v59, %v3030_v33  ;;  %v711_v53 = vmul.f32 %v1532_v21, %v647_v44 }
 0x205   : > { %v693_v0 = vmul.f32 1.442695, %v3028_v62  ;;  %v651_v62 = vld [vmem:[#allocation3 + $0x50] sm:$0xff] }
 0x206   : > { %820 = vst.msk [vmem:[#allocation3 + $0x10] sm:$0xff] %vm2900_vm1, %v803_v30  ;;  %v699_v9 = vmul.f32 1.442695, %v3031_v41  ;;  %v3033_v30 = vld [vmem:[#allocation77_spill] sm:$0xff] }
 0x207   : > { %1541 = vpow2.f32 %v693_v0  ;;  %v3034_v15 = vsub.f32 %v3032_v39, %v3033_v30  ;;  %v654_v0 = vld [vmem:[#allocation3 + $0x68] sm:$0xff] }
 0x208   : > { %v740_v14 = vpop.xlane.xlu1 %739  ;;  %1543 = vpow2.f32 %v699_v9 }
 0x209   : > { %v804_v12 = vadd.f32 %v740_v14, %v708_v17  ;;  %v697_v17 = vmul.f32 1.442695, %v3034_v15  ;;  %v3036_v14 = vld [vmem:[#allocation79_spill] sm:$0xff] }
 0x20a   : > { %v3037_v5 = vsub.f32 %v3035_v27, %v3036_v14  ;;  %v1538_v40 = vpop.eup %1537 }
 0x20b   : > { %821 = vst.msk [vmem:[#allocation3 + $0x18] sm:$0xff] %vm2900_vm1, %v804_v12  ;;  %1545 = vpow2.f32 %v697_v17 }
 0x20c   : > { %v745_v24 = vpop.xlane.xlu0 %744  ;;  %v703_v11 = vmul.f32 1.442695, %v3037_v5 }
 0x20d   : > { %v805_v46 = vadd.f32 %v745_v24, %v709_v16  ;;  %v650_v16 = vld [vmem:[#allocation3 + $0x48] sm:$0xff]  ;;  %v3038_v24 = vld [vmem:[#allocation78_spill] sm:$0xff] }
 0x20e   : > { %1547 = vpow2.f32 %v703_v11  ;;  %v3040_v45 = vsub.f32 %v3038_v24, %v3039_v37  ;;  %v714_v29 = vmul.f32 %v1536_v7, %v650_v16  ;;  %v655_v11 = vld [vmem:[#allocation3 + $0x70] sm:$0xff]  ;;  %v858_v24 = vlaneseq (!%p2412_p5) }
 0x20f   : > { %822 = vst.msk [vmem:[#allocation3 + $0x20] sm:$0xff] %vm2900_vm1, %v805_v46  ;;  %v1540_v46 = vpop.eup %1539 }
 0x210   : > { %v750_v23 = vpop.xlane.xlu1 %749  ;;  %v701_v43 = vmul.f32 1.442695, %v3040_v45  ;;  %v716_v44 = vmul.f32 %v1540_v46, %v652_v25  ;;  %v2482_v37 = vshrl.u32 (!%p2412_p5), %v858_v24, 7  ;;  %v2492_v25 = vstv (!%p2412_p5), %s2401_s17 }
 0x211   : > { %v806_v51 = vadd.f32 %v750_v23, %v710_v1  ;;  %v1542_v21 = vpop.eup %1541  ;;  %v713_v1 = vmul.f32 %v1538_v40, %v649_v48 }
 0x212   : > { %1549 = vpow2.f32 %v701_v43  ;;  %v1544_v23 = vpop.eup %1543  ;;  %v715_v41 = vmul.f32 %v1542_v21, %v651_v62  ;;  %v868_v45 = vadd.s32 (!%p2412_p5), 72, %v2482_v37  ;;  %v869_v43 = vadd.s32 (!%p2412_p5), 80, %v2482_v37 }
 0x213   : > { %823 = vst.msk [vmem:[#allocation3 + $0x28] sm:$0xff] %vm2900_vm1, %v806_v51  ;;  %v755_v57 = vpop.xlane.xlu0 %754  ;;  %v718_v9 = vmul.f32 %v1544_v23, %v654_v0  ;;  %v870_v40 = vadd.s32 (!%p2412_p5), 88, %v2482_v37  ;;  %v872_v46 = vadd.s32 (!%p2412_p5), 104, %v2482_v37  ;;  %v874_v48 = vadd.s32 (!%p2412_p5), 120, %v2482_v37 }
 0x214   : > { %v807_v35 = vadd.f32 %v755_v57, %v711_v53  ;;  %v2498_v21 = vadd.s32 (!%p2412_p5), %v2492_v25, %v869_v43  ;;  %v2515_v62 = vand.u32 (!%p2412_p5), 127, %v858_v24 }
 0x215   : > { %v1546_v33 = vpop.eup %1545  ;;  %v2507_v23 = vadd.s32 (!%p2412_p5), %v2492_v25, %v872_v46 }
 0x216   : > { %824 = vst.msk [vmem:[#allocation3 + $0x30] sm:$0xff] %vm2900_vm1, %v807_v35  ;;  %v653_v35 = vld [vmem:[#allocation3 + $0x60] sm:$0xff]  ;;  %v2518_v0 = vadd.s32 (!%p2412_p5), 128, %v2515_v62  ;;  %vm942_vm6 = vcmp.eq.s32.totalorder (!%p2412_p5), %v2498_v21, %v2515_v62 }
 0x217   : > { %v717_v15 = vmul.f32 %v1546_v33, %v653_v35  ;;  %v876_v33 = vadd.s32 (!%p2412_p5), %v2492_v25, %v2482_v37 }
 0x218   : > { %v1548_v53 = vpop.eup %1547  ;;  %vm943_vm7 = vcmp.eq.s32.totalorder (!%p2412_p5), %v2498_v21, %v2518_v0 }
 0x219   : > { %v720_v17 = vmul.f32 %v1548_v53, %v656_v32  ;;  %vm902_vm0 = vcmp.eq.s32.totalorder (!%p2412_p5), %v876_v33, %v2515_v62  ;;  %vm903_vm11 = vcmp.eq.s32.totalorder (!%p2412_p5), %v876_v33, %v2518_v0  ;;  %v3041_v53 = vld [vmem:[#allocation8_spill] sm:$0xff] (!%p2412_p5)  ;;  %v3043_v32 = vld [vmem:[#allocation10_spill] sm:$0xff] (!%p2412_p5) }
 0x21a   : > { %v760_v12 = vpop.xlane.xlu1 %759 }
 0x21b   : > { %v808_v6 = vadd.f32 %v760_v12, %v712_v54 }
 0x21c   : > { %v1550_v27 = vpop.eup %1549 }
 0x21d   : > { %825 = vst.msk [vmem:[#allocation3 + $0x38] sm:$0xff] %vm2900_vm1, %v808_v6  ;;  %v719_v12 = vmul.f32 %v1550_v27, %v655_v11 }
 0x21e   : > { %v770_v42 = vpop.xlane.xlu1 %769 }
 0x21f   : > { %v810_v58 = vadd.f32 %v770_v42, %v714_v29  ;;  %v871_v29 = vadd.s32 (!%p2412_p5), 96, %v2482_v37  ;;  %v873_v42 = vadd.s32 (!%p2412_p5), 112, %v2482_v37 }
 0x221   : > { %827 = vst.msk [vmem:[#allocation3 + $0x48] sm:$0xff] %vm2900_vm1, %v810_v58  ;;  %v2495_v58 = vadd.s32 (!%p2412_p5), %v2492_v25, %v868_v45 }
 0x222   : > { %v765_v22 = vpop.xlane.xlu0 %764  ;;  %v780_v52 = vpop.xlane.xlu1 %779 }
 0x223   : > { %v809_v51 = vadd.f32 %v765_v22, %v713_v1  ;;  %v812_v59 = vadd.f32 %v780_v52, %v716_v44  ;;  %v2501_v1 = vadd.s32 (!%p2412_p5), %v2492_v25, %v870_v40  ;;  %v2504_v44 = vadd.s32 (!%p2412_p5), %v2492_v25, %v871_v29 }
 0x224   : > { %v2510_v22 = vadd.s32 (!%p2412_p5), %v2492_v25, %v873_v42  ;;  %v2513_v52 = vadd.s32 (!%p2412_p5), %v2492_v25, %v874_v48  ;;  %vm938_vm2 = vcmp.eq.s32.totalorder (!%p2412_p5), %v2495_v58, %v2515_v62  ;;  %vm939_vm3 = vcmp.eq.s32.totalorder (!%p2412_p5), %v2495_v58, %v2518_v0  ;;  %v3044_v42 = vld [vmem:[#allocation11_spill] sm:$0xff] (!%p2412_p5) }
 0x225   : > { %826 = vst.msk [vmem:[#allocation3 + $0x40] sm:$0xff] %vm2900_vm1, %v809_v51  ;;  %829 = vst.msk [vmem:[#allocation3 + $0x58] sm:$0xff] %vm2900_vm1, %v812_v59  ;;  %v2521_v51 = vadd.s32 (!%p2412_p5), 256, %v2515_v62  ;;  %v2524_v59 = vadd.s32 (!%p2412_p5), 384, %v2515_v62  ;;  %vm946_vm10 = vcmp.eq.s32.totalorder (!%p2412_p5), %v2501_v1, %v2515_v62  ;;  %v863_v29 = vadd.s32 (!%p2412_p5), 32, %v2482_v37 }
 0x226   : > { %v775_v57 = vpop.xlane.xlu0 %774  ;;  %v790_v36 = vpop.xlane.xlu1 %789 }
 0x227   : > { %v811_v39 = vadd.f32 %v775_v57, %v715_v41  ;;  %v814_v30 = vadd.f32 %v790_v36, %v718_v9  ;;  %vm940_vm4 = vcmp.eq.s32.totalorder (!%p2412_p5), %v2495_v58, %v2521_v51  ;;  %vm941_vm5 = vcmp.eq.s32.totalorder (!%p2412_p5), %v2495_v58, %v2524_v59  ;;  %v3042_v36 = vld [vmem:[#allocation9_spill] sm:$0xff] (!%p2412_p5) }
 0x228   : > { %vm944_vm8 = vcmp.eq.s32.totalorder (!%p2412_p5), %v2498_v21, %v2521_v51  ;;  %vm945_vm9 = vcmp.eq.s32.totalorder (!%p2412_p5), %v2498_v21, %v2524_v59  ;;  %v860_v41 = vadd.s32 (!%p2412_p5), 8, %v2482_v37  ;;  %vm904_vm12 = vcmp.eq.s32.totalorder (!%p2412_p5), %v876_v33, %v2521_v51 }
 0x229   : > { %828 = vst.msk [vmem:[#allocation3 + $0x50] sm:$0xff] %vm2900_vm1, %v811_v39  ;;  %831 = vst.msk [vmem:[#allocation3 + $0x68] sm:$0xff] %vm2900_vm1, %v814_v30  ;;  %v967_v57 = vsel (!%p2412_p5), %vm902_vm0, %v3041_v53, 0.0  ;;  %v968_v35 = vsel (!%p2412_p5), %vm903_vm11, %v3042_v36, 0.0  ;;  %vm905_vm14 = vcmp.eq.s32.totalorder (!%p2412_p5), %v876_v33, %v2524_v59  ;;  %v969_v39 = vsel (!%p2412_p5), %vm904_vm12, %v3043_v32, 0.0  ;;  %v3046_v53 = vld [vmem:[#allocation13_spill] sm:$0xff] (!%p2412_p5) }
 0x22a   : > { %v785_v14 = vpop.xlane.xlu0 %784  ;;  %v800_v5 = vpop.xlane.xlu1 %799  ;;  %v877_v9 = vadd.s32 (!%p2412_p5), %v2492_v25, %v860_v41  ;;  %v861_v30 = vadd.s32 (!%p2412_p5), 16, %v2482_v37  ;;  %v880_v33 = vadd.s32 (!%p2412_p5), %v2492_v25, %v863_v29  ;;  %v3045_v41 = vld [vmem:[#allocation12_spill] sm:$0xff] (!%p2412_p5)  ;;  %v864_v36 = vadd.s32 (!%p2412_p5), 40, %v2482_v37  ;;  %v3053_v29 = vld [vmem:[#allocation17_spill] sm:$0xff] (!%p2412_p5) }
 0x22b   : > { %v813_v54 = vadd.f32 %v785_v14, %v717_v15  ;;  %v816_v7 = vadd.f32 %v800_v5, %v720_v17  ;;  %857 = sbr.rel (%p2412_p5) target bundleno = 889 (0x379), region = 36  ;;  %v1031_v15 = vadd.f32 (!%p2412_p5), %v968_v35, %v967_v57  ;;  %v970_v17 = vsel (!%p2412_p5), %vm905_vm14, %v1847_v13, 0.0  ;;  %v3047_v35 = vld [vmem:[#allocation14_spill] sm:$0xff] (!%p2412_p5) }
 0x22c   : > { %vm906_vm15 = vcmp.eq.s32.totalorder (!%p2412_p5), %v877_v9, %v2515_v62  ;;  %vm907_vm13 = vcmp.eq.s32.totalorder (!%p2412_p5), %v877_v9, %v2518_v0  ;;  %v878_v5 = vadd.s32 (!%p2412_p5), %v2492_v25, %v861_v30  ;;  %vm908_vm0 = vcmp.eq.s32.totalorder (!%p2412_p5), %v877_v9, %v2521_v51  ;;  %v3048_v30 = vld [vmem:[#allocation22_spill] sm:$0xff] (!%p2412_p5) }
 0x22d   : > { %830 = vst.msk [vmem:[#allocation3 + $0x60] sm:$0xff] %vm2900_vm1, %v813_v54  ;;  %833 = vst.msk [vmem:[#allocation3 + $0x78] sm:$0xff] %vm2900_vm1, %v816_v7  ;;  %v1032_v27 = vadd.f32 (!%p2412_p5), %v1031_v15, %v969_v39  ;;  %v971_v14 = vsel (!%p2412_p5), %vm906_vm15, %v1859_v18, 0.0  ;;  %v972_v54 = vsel (!%p2412_p5), %vm907_vm13, %v1862_v19, 0.0  ;;  %vm909_vm11 = vcmp.eq.s32.totalorder (!%p2412_p5), %v877_v9, %v2524_v59 }
 0x22e   : > { %v795_v16 = vpop.xlane.xlu0 %794  ;;  %vm910_vm12 = vcmp.eq.s32.totalorder (!%p2412_p5), %v878_v5, %v2515_v62  ;;  %vm911_vm14 = vcmp.eq.s32.totalorder (!%p2412_p5), %v878_v5, %v2518_v0  ;;  %vm912_vm13 = vcmp.eq.s32.totalorder (!%p2412_p5), %v878_v5, %v2521_v51  ;;  %vm913_vm15 = vcmp.eq.s32.totalorder (!%p2412_p5), %v878_v5, %v2524_v59 }
 0x22f   : > { %v815_v6 = vadd.f32 %v795_v16, %v719_v12  ;;  %v1033_v11 = vadd.f32 (!%p2412_p5), %v1032_v27, %v970_v17  ;;  %v973_v12 = vsel (!%p2412_p5), %vm908_vm0, %v1865_v20, 0.0  ;;  %v862_v16 = vadd.s32 (!%p2412_p5), 24, %v2482_v37 }
 0x230   : > { %v975_v24 = vsel (!%p2412_p5), %vm910_vm12, %v1818_v2, 0.0  ;;  %v976_v43 = vsel (!%p2412_p5), %vm911_vm14, %v1821_v3, 0.0  ;;  %v977_v40 = vsel (!%p2412_p5), %vm912_vm13, %v1824_v4, 0.0  ;;  %v978_v46 = vsel (!%p2412_p5), %vm913_vm15, %v1835_v8, 0.0 }
 0x231   : > { %832 = vst.msk [vmem:[#allocation3 + $0x70] sm:$0xff] %vm2900_vm1, %v815_v6  ;;  %vm959_vm1 = vcmp.eq.s32.totalorder (!%p2412_p5), %v2510_v22, %v2518_v0  ;;  %v1034_v7 = vadd.f32 (!%p2412_p5), %v1033_v11, %v971_v14  ;;  %v974_v6 = vsel (!%p2412_p5), %vm909_vm11, %v1882_v28, 0.0  ;;  %v879_v45 = vadd.s32 (!%p2412_p5), %v2492_v25, %v862_v16  ;;  %v3049_v14 = vld [vmem:[#allocation23_spill] sm:$0xff] (!%p2412_p5) }
 0x232   : > { %vm918_vm13 = vcmp.eq.s32.totalorder %v880_v33, %v2515_v62  ;;  %vm919_vm15 = vcmp.eq.s32.totalorder %v880_v33, %v2518_v0  ;;  %v881_v17 = vadd.s32 %v2492_v25, %v864_v36 }
 0x233   : > { %v1035_v13 = vadd.f32 %v1034_v7, %v972_v54  ;;  %vm914_vm0 = vcmp.eq.s32.totalorder %v879_v45, %v2515_v62  ;;  %vm915_vm11 = vcmp.eq.s32.totalorder %v879_v45, %v2518_v0  ;;  %vm916_vm12 = vcmp.eq.s32.totalorder %v879_v45, %v2521_v51  ;;  %v3050_v54 = vld [vmem:[#allocation24_spill] sm:$0xff] }
 0x234   : > { %v979_v48 = vsel %vm914_vm0, %v3044_v42, 0.0  ;;  %v980_v9 = vsel %vm915_vm11, %v3045_v41, 0.0  ;;  %vm917_vm14 = vcmp.eq.s32.totalorder %v879_v45, %v2524_v59  ;;  %v981_v57 = vsel %vm916_vm12, %v3046_v53, 0.0 }
 0x235   : > { %v1036_v18 = vadd.f32 %v1035_v13, %v973_v12  ;;  %v982_v32 = vsel %vm917_vm14, %v3047_v35, 0.0  ;;  %v983_v15 = vsel %vm918_vm13, %v3048_v30, 0.0  ;;  %vm920_vm0 = vcmp.eq.s32.totalorder %v880_v33, %v2521_v51 }
 0x236   : > { %v984_v5 = vsel %vm919_vm15, %v3049_v14, 0.0  ;;  %vm921_vm11 = vcmp.eq.s32.totalorder %v880_v33, %v2524_v59  ;;  %v985_v7 = vsel %vm920_vm0, %v3050_v54, 0.0  ;;  %v865_v12 = vadd.s32 48, %v2482_v37  ;;  %v3057_v14 = vld [vmem:[#allocation33_spill] sm:$0xff] }
 0x237   : > { %v1037_v19 = vadd.f32 %v1036_v18, %v974_v6  ;;  %vm922_vm12 = vcmp.eq.s32.totalorder %v881_v17, %v2515_v62  ;;  %v986_v13 = vsel %vm921_vm11, %v1932_v50, 0.0  ;;  %vm923_vm14 = vcmp.eq.s32.totalorder %v881_v17, %v2518_v0  ;;  %v3051_v18 = vld [vmem:[#allocation15_spill] sm:$0xff] }
 0x238   : > { %v882_v45 = vadd.s32 %v2492_v25, %v865_v12  ;;  %vm924_vm13 = vcmp.eq.s32.totalorder %v881_v17, %v2521_v51  ;;  %vm925_vm15 = vcmp.eq.s32.totalorder %v881_v17, %v2524_v59  ;;  %v3056_v17 = vld [vmem:[#allocation32_spill] sm:$0xff]  ;;  %v3059_v12 = vld [vmem:[#allocation37_spill] sm:$0xff] }
 0x239   : > { %v1038_v20 = vadd.f32 %v1037_v19, %v975_v24  ;;  %v987_v24 = vsel %vm922_vm12, %v3051_v18, 0.0 }
 0x23a   : > { %vm926_vm0 = vcmp.eq.s32.totalorder %v882_v45, %v2515_v62  ;;  %vm927_vm11 = vcmp.eq.s32.totalorder %v882_v45, %v2518_v0  ;;  %vm928_vm12 = vcmp.eq.s32.totalorder %v882_v45, %v2521_v51 }
 0x23b   : > { %v1039_v28 = vadd.f32 %v1038_v20, %v976_v43  ;;  %v3052_v43 = vld [vmem:[#allocation16_spill] sm:$0xff]  ;;  %v991_v33 = vsel %vm926_vm0, %v1945_v55, 0.0  ;;  %v993_v53 = vsel %vm928_vm12, %v1958_v60, 0.0 }
 0x23c   : > { %v988_v20 = vsel %vm923_vm14, %v3052_v43, 0.0  ;;  %vm929_vm14 = vcmp.eq.s32.totalorder %v882_v45, %v2524_v59  ;;  %v3062_v43 = vld [vmem:[#allocation25_spill] sm:$0xff] }
 0x23d   : > { %v1040_v2 = vadd.f32 %v1039_v28, %v977_v40  ;;  %v989_v28 = vsel %vm924_vm13, %v3053_v29, 0.0  ;;  %v3063_v29 = vld [vmem:[#allocation28_spill] sm:$0xff] }
 0x23f   : > { %v1041_v3 = vadd.f32 %v1040_v2, %v978_v46  ;;  %v866_v46 = vadd.s32 56, %v2482_v37  ;;  %v3054_v2 = vld [vmem:[#allocation18_spill] sm:$0xff] }
 0x240   : > { %v990_v42 = vsel %vm925_vm15, %v3054_v2, 0.0 }
 0x241   : > { %v1042_v4 = vadd.f32 %v1041_v3, %v979_v48  ;;  %v883_v3 = vadd.s32 %v2492_v25, %v866_v46 }
 0x243   : > { %v1043_v8 = vadd.f32 %v1042_v4, %v980_v9  ;;  %v992_v9 = vsel %vm927_vm11, %v1948_v56, 0.0  ;;  %vm930_vm13 = vcmp.eq.s32.totalorder %v883_v3, %v2515_v62  ;;  %vm931_vm15 = vcmp.eq.s32.totalorder %v883_v3, %v2518_v0 }
 0x244   : > { %v995_v35 = vsel %vm930_vm13, %v1890_v31, 0.0  ;;  %vm932_vm0 = vcmp.eq.s32.totalorder %v883_v3, %v2521_v51  ;;  %vm933_vm11 = vcmp.eq.s32.totalorder %v883_v3, %v2524_v59 }
 0x245   : > { %v1044_v39 = vadd.f32 %v1043_v8, %v981_v57  ;;  %v867_v57 = vadd.s32 64, %v2482_v37  ;;  %v994_v8 = vsel %vm929_vm14, %v1973_v10, 0.0  ;;  %v3055_v37 = vld [vmem:[#allocation19_spill] sm:$0xff] }
 0x246   : > { %v997_v30 = vsel %vm932_vm0, %v3055_v37, 0.0  ;;  %vm3085_vm0 = vcmp.eq.s32.totalorder %v2507_v23, %v2521_v51 }
 0x247   : > { %v1045_v27 = vadd.f32 %v1044_v39, %v982_v32  ;;  %v884_v32 = vadd.s32 %v2492_v25, %v867_v57  ;;  %v996_v39 = vsel %vm931_vm15, %v1897_v34, 0.0  ;;  %v3067_v57 = vld [vmem:[#allocation26_spill] sm:$0xff] }
 0x249   : > { %v1046_v11 = vadd.f32 %v1045_v27, %v983_v15  ;;  %vm934_vm12 = vcmp.eq.s32.totalorder %v884_v32, %v2515_v62  ;;  %v998_v15 = vsel %vm933_vm11, %v1926_v47, 0.0  ;;  %vm935_vm14 = vcmp.eq.s32.totalorder %v884_v32, %v2518_v0  ;;  %v3060_v47 = vld [vmem:[#allocation20_spill] sm:$0xff] }
 0x24a   : > { %v999_v25 = vsel %vm934_vm12, %v3056_v17, 0.0  ;;  %vm936_vm13 = vcmp.eq.s32.totalorder %v884_v32, %v2521_v51  ;;  %v1000_v34 = vsel %vm935_vm14, %v3057_v14, 0.0  ;;  %vm937_vm15 = vcmp.eq.s32.totalorder %v884_v32, %v2524_v59 }
 0x24b   : > { %v1047_v16 = vadd.f32 %v1046_v11, %v984_v5  ;;  %v3058_v11 = vld [vmem:[#allocation34_spill] sm:$0xff]  ;;  %vm3087_vm11 = vcmp.eq.s32.totalorder %v2507_v23, %v2524_v59  ;;  %vm3089_vm12 = vcmp.eq.s32.totalorder %v2510_v22, %v2515_v62  ;;  %vm3092_vm14 = vcmp.eq.s32.totalorder %v2510_v22, %v2521_v51 }
 0x24c   : > { %v1001_v54 = vsel %vm936_vm13, %v3058_v11, 0.0  ;;  %vm3094_vm13 = vcmp.eq.s32.totalorder %v2510_v22, %v2524_v59 }
 0x24d   : > { %v1048_v6 = vadd.f32 %v1047_v16, %v985_v7  ;;  %v1002_v16 = vsel %vm937_vm15, %v3059_v12, 0.0  ;;  %vm3096_vm15 = vcmp.eq.s32.totalorder %v2513_v52, %v2515_v62 }
 0x24f   : > { %v1049_v19 = vadd.f32 %v1048_v6, %v986_v13  ;;  %v1003_v6 = vsel %vm938_vm2, %v3060_v47, 0.0  ;;  %vm3069_vm2 = vcmp.eq.s32.totalorder %v2501_v1, %v2518_v0 }
 0x251   : > { %v1050_v40 = vadd.f32 %v1049_v19, %v987_v24  ;;  %v3061_v24 = vld [vmem:[#allocation21_spill] sm:$0xff] }
 0x252   : > { %v1004_v45 = vsel %vm939_vm3, %v3061_v24, 0.0  ;;  %vm3071_vm3 = vcmp.eq.s32.totalorder %v2501_v1, %v2521_v51 }
 0x253   : > { %v1051_v50 = vadd.f32 %v1050_v40, %v988_v20  ;;  %v1005_v20 = vsel %vm940_vm4, %v3062_v43, 0.0  ;;  %vm3073_vm4 = vcmp.eq.s32.totalorder %v2501_v1, %v2524_v59 }
 0x255   : > { %v1052_v48 = vadd.f32 %v1051_v50, %v989_v28  ;;  %v1006_v28 = vsel %vm941_vm5, %v3063_v29, 0.0  ;;  %v3064_v50 = vld [vmem:[#allocation35_spill] sm:$0xff]  ;;  %vm3075_vm5 = vcmp.eq.s32.totalorder %v2504_v44, %v2515_v62 }
 0x256   : > { %v1007_v2 = vsel %vm942_vm6, %v3064_v50, 0.0  ;;  %vm3077_vm6 = vcmp.eq.s32.totalorder %v2504_v44, %v2518_v0 }
 0x257   : > { %v1053_v41 = vadd.f32 %v1052_v48, %v990_v42  ;;  %v3065_v48 = vld [vmem:[#allocation36_spill] sm:$0xff] }
 0x259   : > { %v1054_v4 = vadd.f32 %v1053_v41, %v991_v33  ;;  %v1008_v33 = vsel %vm943_vm7, %v3065_v48, 0.0  ;;  %v3066_v41 = vld [vmem:[#allocation38_spill] sm:$0xff]  ;;  %vm3078_vm7 = vcmp.eq.s32.totalorder %v2504_v44, %v2521_v51 }
 0x25b   : > { %v1055_v36 = vadd.f32 %v1054_v4, %v992_v9  ;;  %v1009_v9 = vsel %vm944_vm8, %v3066_v41, 0.0  ;;  %v1010_v4 = vsel %vm945_vm9, %v2026_v63, 0.0  ;;  %v3072_v63 = vld [vmem:[#allocation40_spill] sm:$0xff]  ;;  %vm3079_vm8 = vcmp.eq.s32.totalorder %v2504_v44, %v2524_v59 }
 0x25c   : > { %v1018_v14 = vsel %vm3079_vm8, %v2056_v49, 0.0  ;;  %vm3081_vm9 = vcmp.eq.s32.totalorder %v2507_v23, %v2515_v62  ;;  %v3086_v49 = vld [vmem:[#allocation47_spill] sm:$0xff] }
 0x25d   : > { %v1056_v55 = vadd.f32 %v1055_v36, %v993_v53  ;;  %v1011_v36 = vsel %vm946_vm10, %v3067_v57, 0.0  ;;  %vm3083_vm10 = vcmp.eq.s32.totalorder %v2507_v23, %v2518_v0  ;;  %v1022_v47 = vsel %vm3087_vm11, %v3086_v49, 0.0 }
 0x25f   : > { %v1057_v56 = vadd.f32 %v1056_v55, %v994_v8  ;;  %v3068_v55 = vld [vmem:[#allocation27_spill] sm:$0xff] }
 0x261   : > { %v1058_v60 = vadd.f32 %v1057_v56, %v995_v35  ;;  %v1012_v35 = vsel %vm3069_vm2, %v3068_v55, 0.0  ;;  %v3070_v56 = vld [vmem:[#allocation29_spill] sm:$0xff]  ;;  %vm3099_vm2 = vcmp.eq.s32.totalorder %v2513_v52, %v2521_v51 }
 0x263   : > { %v1059_v10 = vadd.f32 %v1058_v60, %v996_v39  ;;  %v1013_v39 = vsel %vm3071_vm3, %v3070_v56, 0.0  ;;  %v1014_v60 = vsel %vm3073_vm4, %v3072_v63, 0.0  ;;  %vm3100_vm3 = vcmp.eq.s32.totalorder %v2513_v52, %v2524_v59 }
 0x264   : > { %vm3101_vm4 = vcmask 0  }
 0x265   : > { %v1060_v31 = vadd.f32 %v1059_v10, %v997_v30  ;;  %v3074_v30 = vld [vmem:[#allocation39_spill] sm:$0xff] }
 0x266   : > { %v1015_v10 = vsel %vm3075_vm5, %v3074_v30, 0.0 }
 0x267   : > { %v1061_v27 = vadd.f32 %v1060_v31, %v998_v15  ;;  %v3076_v31 = vld [vmem:[#allocation42_spill] sm:$0xff] }
 0x268   : > { %v1016_v17 = vsel %vm3077_vm6, %v3076_v31, 0.0 }
 0x269   : > { %v1062_v5 = vadd.f32 %v1061_v27, %v999_v25  ;;  %v1017_v27 = vsel %vm3078_vm7, %v2033_v26, 0.0  ;;  %v3084_v26 = vld [vmem:[#allocation41_spill] sm:$0xff] }
 0x26b   : > { %v1063_v7 = vadd.f32 %v1062_v5, %v1000_v34  ;;  %v3080_v5 = vld [vmem:[#allocation30_spill] sm:$0xff] }
 0x26c   : > { %v1019_v11 = vsel %vm3081_vm9, %v3080_v5, 0.0 }
 0x26d   : > { %v1064_v13 = vadd.f32 %v1063_v7, %v1001_v54  ;;  %v3082_v7 = vld [vmem:[#allocation31_spill] sm:$0xff] }
 0x26e   : > { %v1020_v12 = vsel %vm3083_vm10, %v3082_v7, 0.0 }
 0x26f   : > { %v1065_v18 = vadd.f32 %v1064_v13, %v1002_v16  ;;  %v1021_v13 = vsel %vm3085_vm0, %v3084_v26, 0.0 }
 0x271   : > { %v1066_v19 = vadd.f32 %v1065_v18, %v1003_v6  ;;  %v3088_v18 = vld [vmem:[#allocation45_spill] sm:$0xff] }
 0x272   : > { %v1023_v24 = vsel %vm3089_vm12, %v3088_v18, 0.0 }
 0x273   : > { %v1067_v40 = vadd.f32 %v1066_v19, %v1004_v45  ;;  %v3090_v19 = vld [vmem:[#allocation46_spill] sm:$0xff] }
 0x274   : > { %v1024_v43 = vsel %vm959_vm1, %v3090_v19, 0.0  ;;  %vm3098_vm1 = vcmp.eq.s32.totalorder %v2513_v52, %v2518_v0 }
 0x275   : > { %v1068_v46 = vadd.f32 %v1067_v40, %v1005_v20  ;;  %v3091_v40 = vld [vmem:[#allocation48_spill] sm:$0xff] }
 0x276   : > { %v1025_v29 = vsel %vm3092_vm14, %v3091_v40, 0.0 }
 0x277   : > { %v1069_v42 = vadd.f32 %v1068_v46, %v1006_v28  ;;  %v3093_v28 = vld [vmem:[#allocation49_spill] sm:$0xff] }
 0x278   : > { %v1026_v46 = vsel %vm3094_vm13, %v3093_v28, 0.0 }
 0x279   : > { %v1070_v3 = vadd.f32 %v1069_v42, %v1007_v2  ;;  %v3095_v2 = vld [vmem:[#allocation43_spill] sm:$0xff] }
 0x27a   : > { %v1027_v42 = vsel %vm3096_vm15, %v3095_v2, 0.0 }
 0x27b   : > { %v1071_v58 = vadd.f32 %v1070_v3, %v1008_v33  ;;  %v3097_v33 = vld [vmem:[#allocation44_spill] sm:$0xff] }
 0x27c   : > { %v1028_v3 = vsel %vm3098_vm1, %v3097_v33, 0.0 }
 0x27d   : > { %v1072_v53 = vadd.f32 %v1071_v58, %v1009_v9  ;;  %v1029_v9 = vsel %vm3099_vm2, %v2049_v38, 0.0  ;;  %v1030_v58 = vsel %vm3100_vm3, %v2064_v61, 0.0 }
 0x27f   : > { %v1073_v8 = vadd.f32 %v1072_v53, %v1010_v4 }
 0x281   : > { %v1074_v32 = vadd.f32 %v1073_v8, %v1011_v36 }
 0x283   : > { %v1075_v21 = vadd.f32 %v1074_v32, %v1012_v35  ;;  %v966_v32 = vld [vmem:[#allocation4] sm:$0x1] }
 0x285   : > { %v1076_v37 = vadd.f32 %v1075_v21, %v1013_v39 }
 0x287   : > { %v1077_v15 = vadd.f32 %v1076_v37, %v1014_v60 }
 0x289   : > { %v1078_v25 = vadd.f32 %v1077_v15, %v1015_v10 }
 0x28b   : > { %v1079_v1 = vadd.f32 %v1078_v25, %v1016_v17 }
 0x28d   : > { %v1080_v34 = vadd.f32 %v1079_v1, %v1017_v27 }
 0x28f   : > { %v1081_v54 = vadd.f32 %v1080_v34, %v1018_v14 }
 0x291   : > { %v1082_v16 = vadd.f32 %v1081_v54, %v1019_v11 }
 0x293   : > { %v1083_v44 = vadd.f32 %v1082_v16, %v1020_v12 }
 0x295   : > { %v1084_v6 = vadd.f32 %v1083_v44, %v1021_v13 }
 0x297   : > { %v1085_v45 = vadd.f32 %v1084_v6, %v1022_v47 }
 0x299   : > { %v1086_v20 = vadd.f32 %v1085_v45, %v1023_v24 }
 0x29b   : > { %v1087_v23 = vadd.f32 %v1086_v20, %v1024_v43 }
 0x29d   : > { %v1088_v50 = vadd.f32 %v1087_v23, %v1025_v29 }
 0x29f   : > { %v1089_v48 = vadd.f32 %v1088_v50, %v1026_v46 }
 0x2a1   : > { %v1090_v41 = vadd.f32 %v1089_v48, %v1027_v42 }
 0x2a3   : > { %v1091_v22 = vadd.f32 %v1090_v41, %v1028_v3 }
 0x2a5   : > { %v1092_v62 = vadd.f32 %v1091_v22, %v1029_v9 }
 0x2a7   : > { %v1093_v4 = vadd.f32 %v1092_v62, %v1030_v58 }
 0x2a9   : > { %1094 = vadd.xlane.f32.xlu0 %v1093_v4 }
 0x336   : > { %v1095_v53 = vpop.xlane.xlu0 %1094 }
 0x337   : > { %v1096_v57 = vrot.slane %v1095_v53, 4 }
 0x339   : > { %v1097_v36 = vadd.f32 %v1096_v57, %v1095_v53 }
 0x33b   : > { %v1098_v0 = vrot.slane %v1097_v36, 2 }
 0x33d   : > { %v1099_v8 = vadd.f32 %v1098_v0, %v1097_v36 }
 0x33f   : > { %v1100_v55 = vrot.slane %v1099_v8, 1 }
 0x341   : > { %v1101_v35 = vadd.f32 %v1100_v55, %v1099_v8 }
 0x343   : > { %1323 = vpush %v1101_v35 }
 0x374   : > { %s1324_s29 = spop %1323 }
 0x375   : > { %v1103_v38 = vstv %s1324_s29 }
 0x376   : > { %v1104_v51 = vadd.f32 %v1103_v38, %v966_v32 }
 0x378   : > { %1106 = vst.msk [vmem:[#allocation4] sm:$0x1] %vm3101_vm4, %v1104_v51 }
 0x379 PF: > { %v1126_v52 = vld [vmem:[#allocation3] sm:$0xff]  ;;  %v1127_v61 = vld [vmem:[#allocation3 + $0x8] sm:$0xff]  ;;  %v1128_v59 = vld [vmem:[#allocation3 + $0x10] sm:$0xff]  ;;  %vm3102_vm5 = vcmask 7168  }
 0x37a   : > { %v1129_v56 = vld [vmem:[#allocation3 + $0x18] sm:$0xff]  ;;  %1551 = vlog2.f32 %v1126_v52  ;;  %v1130_v39 = vld [vmem:[#allocation3 + $0x20] sm:$0xff]  ;;  %v1131_v21 = vld [vmem:[#allocation3 + $0x28] sm:$0xff] }
 0x37b   : > { %1553 = vlog2.f32 %v1127_v61  ;;  %v1132_v63 = vld [vmem:[#allocation3 + $0x30] sm:$0xff]  ;;  %v1133_v60 = vld [vmem:[#allocation3 + $0x38] sm:$0xff]  ;;  %v1134_v37 = vld [vmem:[#allocation3 + $0x40] sm:$0xff] }
 0x37c   : > { %1555 = vlog2.f32 %v1128_v59  ;;  %v1135_v30 = vld [vmem:[#allocation3 + $0x48] sm:$0xff]  ;;  %v1136_v10 = vld [vmem:[#allocation3 + $0x50] sm:$0xff]  ;;  %v1110_v31 = vld [vmem:[#allocation2] sm:$0xff] }
 0x37d   : > { %1557 = vlog2.f32 %v1129_v56  ;;  %v1137_v17 = vld [vmem:[#allocation3 + $0x58] sm:$0xff]  ;;  %v1111_v27 = vld [vmem:[#allocation2 + $0x8] sm:$0xff]  ;;  %v1112_v34 = vld [vmem:[#allocation2 + $0x10] sm:$0xff] }
 0x37e   : > { %1559 = vlog2.f32 %v1130_v39  ;;  %v1138_v5 = vld [vmem:[#allocation3 + $0x60] sm:$0xff]  ;;  %v1113_v7 = vld [vmem:[#allocation2 + $0x18] sm:$0xff]  ;;  %v1139_v12 = vld [vmem:[#allocation3 + $0x68] sm:$0xff] }
 0x37f   : > { %1561 = vlog2.f32 %v1131_v21  ;;  %v1114_v44 = vld [vmem:[#allocation2 + $0x20] sm:$0xff]  ;;  %v1115_v18 = vld [vmem:[#allocation2 + $0x28] sm:$0xff]  ;;  %v1140_v20 = vld [vmem:[#allocation3 + $0x70] sm:$0xff] }
 0x380   : > { %1563 = vlog2.f32 %v1132_v63  ;;  %vm3103_vm6 = vmmov %vm3102_vm5  ;;  %v1116_v46 = vld [vmem:[#allocation2 + $0x30] sm:$0xff]  ;;  %v1141_v3 = vld [vmem:[#allocation3 + $0x78] sm:$0xff] }
 0x381   : > { %1565 = vlog2.f32 %v1133_v60  ;;  %vm3104_vm7 = vmmov %vm3102_vm5  ;;  %v1117_v62 = vld [vmem:[#allocation2 + $0x38] sm:$0xff]  ;;  %v1118_v8 = vld [vmem:[#allocation2 + $0x40] sm:$0xff] }
 0x382   : > { %1567 = vlog2.f32 %v1134_v37  ;;  %vm3105_vm8 = vmmov %vm3102_vm5  ;;  %v1119_v52 = vld [vmem:[#allocation2 + $0x48] sm:$0xff]  ;;  %v1120_v63 = vld [vmem:[#allocation2 + $0x50] sm:$0xff] }
 0x383   : > { %1569 = vlog2.f32 %v1135_v30  ;;  %vm3106_vm9 = vmmov %vm3102_vm5 }
 0x384   : > { %v1552_v15 = vpop.eup %1551  ;;  %1571 = vlog2.f32 %v1136_v10  ;;  %vm3107_vm10 = vmmov %vm3102_vm5 }
 0x385   : > { %v1554_v25 = vpop.eup %1553  ;;  %v1143_v1 = vmul.f32 0.6931472, %v1552_v15  ;;  %1573 = vlog2.f32 %v1137_v17  ;;  %vm3108_vm0 = vmmov %vm3102_vm5 }
 0x386   : > { %v1556_v14 = vpop.eup %1555  ;;  %v1145_v11 = vmul.f32 0.6931472, %v1554_v25  ;;  %1575 = vlog2.f32 %v1138_v5  ;;  %vm3109_vm11 = vmmov %vm3108_vm0 }
 0x387   : > { %v1558_v54 = vpop.eup %1557  ;;  %v1147_v16 = vmul.f32 0.6931472, %v1556_v14  ;;  %v1174_v26 = vadd.f32 %v1143_v1, %v1110_v31  ;;  %1577 = vlog2.f32 %v1139_v12  ;;  %v1121_v31 = vld [vmem:[#allocation2 + $0x58] sm:$0xff]  ;;  %vm3110_vm12 = vmmov %vm3108_vm0 }
 0x388   : > { %v1560_v13 = vpop.eup %1559  ;;  %v1149_v49 = vmul.f32 0.6931472, %v1558_v54  ;;  %v1175_v47 = vadd.f32 %v1145_v11, %v1111_v27  ;;  %1579 = vlog2.f32 %v1140_v20  ;;  %vm3111_vm14 = vmmov %vm3108_vm0 }
 0x389   : > { %v1562_v6 = vpop.eup %1561  ;;  %v1151_v24 = vmul.f32 0.6931472, %v1560_v13  ;;  %v1176_v45 = vadd.f32 %v1147_v16, %v1112_v34  ;;  %v1190_v19 = vsel %vm3102_vm5, %v1174_v26, 0.0  ;;  %1581 = vlog2.f32 %v1141_v3  ;;  %v1122_v34 = vld [vmem:[#allocation2 + $0x60] sm:$0xff]  ;;  %v1123_v16 = vld [vmem:[#allocation2 + $0x68] sm:$0xff]  ;;  %vm3112_vm13 = vmmov %vm3108_vm0 }
 0x38a   : > { %v1564_v43 = vpop.eup %1563  ;;  %v1153_v40 = vmul.f32 0.6931472, %v1562_v6  ;;  %v1177_v29 = vadd.f32 %v1149_v49, %v1113_v7  ;;  %v1191_v23 = vsel %vm3103_vm6, %v1175_v47, 0.0  ;;  %v1124_v47 = vld [vmem:[#allocation2 + $0x70] sm:$0xff]  ;;  %vm3113_vm15 = vmmov %vm3108_vm0  ;;  %vm3118_vm5 = vcmask 0  }
 0x38b   : > { %v1566_v28 = vpop.eup %1565  ;;  %v1155_v50 = vmul.f32 0.6931472, %v1564_v43  ;;  %v1178_v2 = vadd.f32 %v1151_v24, %v1114_v44  ;;  %v1192_v42 = vadd.f32 %v1191_v23, %v1190_v19  ;;  %v1193_v48 = vsel %vm3104_vm7, %v1176_v45, 0.0  ;;  %v1125_v19 = vld [vmem:[#allocation2 + $0x78] sm:$0xff]  ;;  %vm3114_vm1 = vmmov %vm3108_vm0 }
 0x38c   : > { %v1568_v33 = vpop.eup %1567  ;;  %v1157_v41 = vmul.f32 0.6931472, %v1566_v28  ;;  %v1179_v9 = vadd.f32 %v1153_v40, %v1115_v18  ;;  %v1195_v22 = vsel %vm3105_vm8, %v1177_v29, 0.0  ;;  %vm3115_vm2 = vmmov %vm3108_vm0 }
 0x38d   : > { %v1570_v58 = vpop.eup %1569  ;;  %v1194_v4 = vadd.f32 %v1193_v48, %v1192_v42  ;;  %v1159_v53 = vmul.f32 0.6931472, %v1568_v33  ;;  %v1180_v57 = vadd.f32 %v1155_v50, %v1116_v46  ;;  %v1197_v36 = vsel %vm3106_vm9, %v1178_v2, 0.0  ;;  %vm3116_vm3 = vmmov %vm3108_vm0 }
 0x38e   : > { %v1572_v0 = vpop.eup %1571  ;;  %v1161_v35 = vmul.f32 0.6931472, %v1570_v58  ;;  %v1181_v32 = vadd.f32 %v1157_v41, %v1117_v62  ;;  %v1199_v38 = vsel %vm3107_vm10, %v1179_v9, 0.0  ;;  %vm3117_vm4 = vmmov %vm3108_vm0 }
 0x38f   : > { %v1196_v55 = vadd.f32 %v1195_v22, %v1194_v4  ;;  %v1574_v51 = vpop.eup %1573  ;;  %v1163_v59 = vmul.f32 0.6931472, %v1572_v0  ;;  %v1182_v56 = vadd.f32 %v1159_v53, %v1118_v8  ;;  %v1201_v39 = vsel %vm3108_vm0, %v1180_v57, 0.0  ;;  %v1230_v53 = vld [vmem:[#allocation4] sm:$0x1] }
 0x390   : > { %v1576_v21 = vpop.eup %1575  ;;  %v1165_v30 = vmul.f32 0.6931472, %v1574_v51  ;;  %v1183_v10 = vadd.f32 %v1161_v35, %v1119_v52  ;;  %v1203_v15 = vsel %vm3109_vm11, %v1181_v32, 0.0 }
 0x391   : > { %v1198_v61 = vadd.f32 %v1197_v36, %v1196_v55  ;;  %v1578_v37 = vpop.eup %1577  ;;  %v1167_v25 = vmul.f32 0.6931472, %v1576_v21  ;;  %v1184_v27 = vadd.f32 %v1163_v59, %v1120_v63  ;;  %v1205_v1 = vsel %vm3110_vm12, %v1182_v56, 0.0 }
 0x392   : > { %v1580_v14 = vpop.eup %1579  ;;  %v1169_v11 = vmul.f32 0.6931472, %v1578_v37  ;;  %v1185_v54 = vadd.f32 %v1165_v30, %v1121_v31  ;;  %v1207_v7 = vsel %vm3111_vm14, %v1183_v10, 0.0 }
 0x393   : > { %v1200_v60 = vadd.f32 %v1199_v38, %v1198_v61  ;;  %v1582_v12 = vpop.eup %1581  ;;  %v1171_v13 = vmul.f32 0.6931472, %v1580_v14  ;;  %v1186_v44 = vadd.f32 %v1167_v25, %v1122_v34  ;;  %v1209_v49 = vsel %vm3112_vm13, %v1184_v27, 0.0 }
 0x394   : > { %v1173_v18 = vmul.f32 0.6931472, %v1582_v12  ;;  %v1187_v24 = vadd.f32 %v1169_v11, %v1123_v16  ;;  %v1211_v45 = vsel %vm3113_vm15, %v1185_v54, 0.0 }
 0x395   : > { %v1202_v17 = vadd.f32 %v1201_v39, %v1200_v60  ;;  %v1188_v20 = vadd.f32 %v1171_v13, %v1124_v47  ;;  %v1213_v40 = vsel %vm3114_vm1, %v1186_v44, 0.0 }
 0x396   : > { %v1189_v23 = vadd.f32 %v1173_v18, %v1125_v19  ;;  %v1215_v28 = vsel %vm3115_vm2, %v1187_v24, 0.0 }
 0x397   : > { %v1204_v5 = vadd.f32 %v1203_v15, %v1202_v17  ;;  %v1217_v50 = vsel %vm3116_vm3, %v1188_v20, 0.0 }
 0x398   : > { %v1219_v42 = vsel %vm3117_vm4, %v1189_v23, 0.0 }
 0x399   : > { %v1206_v26 = vadd.f32 %v1205_v1, %v1204_v5 }
 0x39b   : > { %v1208_v6 = vadd.f32 %v1207_v7, %v1206_v26 }
 0x39d   : > { %v1210_v43 = vadd.f32 %v1209_v49, %v1208_v6 }
 0x39f   : > { %v1212_v29 = vadd.f32 %v1211_v45, %v1210_v43 }
 0x3a1   : > { %v1214_v46 = vadd.f32 %v1213_v40, %v1212_v29 }
 0x3a3   : > { %v1216_v2 = vadd.f32 %v1215_v28, %v1214_v46 }
 0x3a5   : > { %v1218_v48 = vadd.f32 %v1217_v50, %v1216_v2 }
 0x3a7   : > { %v1220_v33 = vadd.f32 %v1219_v42, %v1218_v48 }
 0x3a9   : > { %1221 = vadd.xlane.f32.xlu0 %v1220_v33 }
 0x436   : > { %v1222_v3 = vpop.xlane.xlu0 %1221 }
 0x437   : > { %v1223_v41 = vrot.slane %v1222_v3, 4 }
 0x439   : > { %v1224_v9 = vadd.f32 %v1223_v41, %v1222_v3 }
 0x43b   : > { %v1225_v22 = vrot.slane %v1224_v9, 2 }
 0x43d   : > { %v1226_v58 = vadd.f32 %v1225_v22, %v1224_v9 }
 0x43f   : > { %v1227_v62 = vrot.slane %v1226_v58, 1 }
 0x441   : > { %v1228_v4 = vadd.f32 %v1227_v62, %v1226_v58 }
 0x443   : > { %1325 = vpush %v1228_v4 }
 0x444   : > { %1327 = vpush %v1230_v53 }
 0x474   : > { %s1326_s30 = spop %1325 }
 0x475   : > { %s1328_s2 = spop %1327 }
 0x476   : > { %s1233_s3 = ssub.f32 %s1326_s30, %s1328_s2 }
 0x478   : > { %v1234_v57 = vstv %s1233_s3 }
 0x479   : > { %1236 = vst.msk [vmem:[%s151_s27] sm:$0x1] %vm3118_vm5, %v1234_v57 }
 0x47a PF: > { %s14_s11 = sadd.s32 1, %s1663_s11   ;;  %s3119_s6 = smov %s1647_s7 }
 0x47b   : > { %p11_p6 = scmp.ge.s32.totalorder %s14_s11, 4   ;;  %s3120_s7 = smov %s1651_s8 }
 0x47c   : > { %s3121_s8 = smov %s1730_s18  ;;  %s3122_s9 = smov %s1659_s10 }
 0x47d   : > { %s3123_s10 = smov %s3125_s13  ;;  %13 = sbr.rel (!%p11_p6) target bundleno = 4 (0x4), region = 76 }
 0x484   :  { %1254 = vsyncpa [#allocation6], 1 }
 0x485   :  { %1256 = vsyncpa [#allocation6 + $0x1], 1 }

</bundles_post_ra>
